<compile_context>
chip_gen: v6e
topology: v6e:2x2x1
jax: 0.10.0
libtpu: 0.0.40
codegen_flags: <defaults>
</compile_context>

<pallas_src>
import math
from functools import partial

import jax
import jax.numpy as jnp
from jax import lax
from jax.experimental import pallas as pl
from jax.experimental.pallas import tpu as pltpu


# ----------------------------- Pallas kernel -------------------------------

def _residual_conv_block_kernel(x_ref, w0_ref, b0_ref, wrest_ref, brest_ref,
                                wr_ref, br_ref, out_ref, pad_ref, *, H, W):
    # x_ref:      (1, Cin, H*Wp)   wide form (row stride Wp=W+2; pad cols are 0)
    # w0_ref:     (9, Cout, Cin)   per-tap 3x3 weights, tap t = dy*3 + dx
    # b0_ref:     (Cout, 1)
    # wrest_ref:  (27, Cout, Cout) conv1..conv3 per-tap weights, layer-major
    # brest_ref:  (3, Cout, 1)
    # wr_ref:     (Cout, Cin)      1x1 residual conv
    # br_ref:     (Cout, 1)
    # out_ref:    (1, Cout, H*Wp)  wide form (wrapper slices off the pad cols)
    # pad_ref:    VMEM (Cmax, (H+3)*Wp)  zero-haloed activation scratch
    Cin = x_ref.shape[1]
    Cout = out_ref.shape[1]
    Cmax = pad_ref.shape[0]
    Wp = W + 2
    S = H * Wp  # "wide" spatial extent (includes 2 pad columns per row)

    # --- halo-only clear (once per grid step) ---------------------------------
    # The strip [Wp+1, Wp+1+S) is fully rewritten before every conv reads it;
    # only the read-but-never-written halo positions need zeros:
    #   top:    [0, Wp+1)                  (top pad row + left pad of row 0)
    #   bottom: [(H+1)*Wp+1, (H+3)*Wp)     (right pad of last row + bottom rows)
    pad_ref[:, 0:Wp + 1] = jnp.zeros((Cmax, Wp + 1), jnp.float32)
    pad_ref[:, (H + 1) * Wp + 1:(H + 3) * Wp] = jnp.zeros((Cmax, 2 * Wp - 1),
                                                          jnp.float32)

    def conv3x3(C, get_w, bias):
        # 9 accumulating per-tap MXU dots over shifted flat windows of pad_ref
        # (no materialized im2col tile).
        acc = None
        for t in range(9):
            dy, dx = divmod(t, 3)
            off = dy * Wp + dx
            part = jnp.dot(get_w(t), pad_ref[0:C, off:off + S],
                           preferred_element_type=jnp.float32)
            acc = part if acc is None else acc + part
        return acc + bias

    # --- layer 0: conv0(relu(x)) ----------------------------------------------
    # Input arrives already in wide form with zero pad columns (relu keeps them
    # zero), so the scatter is a single lane-dense strip store.
    pad_ref[0:Cin, Wp + 1:Wp + 1 + S] = jnp.maximum(x_ref[0], 0.0)
    y = conv3x3(Cin, lambda t: w0_ref[t], b0_ref[...])            # (Cout, S)

    # Columns with (g mod Wp) >= W are out-of-image; masking them keeps the
    # left/right halo columns of the padded scratch at zero on every rewrite.
    col = lax.broadcasted_iota(jnp.int32, (1, S), 1)
    valid = (col % Wp) < W

    # --- layers 1..3: conv_l(relu(y)) -------------------------------------------
    for l in range(3):
        pad_ref[0:Cout, Wp + 1:Wp + 1 + S] = jnp.where(
            valid, jnp.maximum(y, 0.0), 0.0)
        y = conv3x3(Cout, lambda t, l=l: wrest_ref[l * 9 + t], brest_ref[l])

    # --- residual 1x1 conv on the ORIGINAL (un-relu'd) input ---------------------
    # x_ref is re-read here (cheap VMEM re-read) instead of being held live
    # across the 4 conv layers.
    res = jnp.dot(wr_ref[...], x_ref[0],
                  preferred_element_type=jnp.float32) + br_ref[...]

    # --- combine: one lane-dense full-block store in wide form -------------------
    out_ref[0, :, :] = (res + y).astype(out_ref.dtype)


# ------------------------------- Wrapper ------------------------------------

def residual_conv_block(x_nchw, params):
    """x_nchw: (N, Cin, H, W) float32. Returns (N, Cout, H, W) float32."""
    N, Cin, H, W = x_nchw.shape
    Cout = params["b0"].shape[0]
    Cmax = max(Cin, Cout)
    Wp = W + 2
    S = H * Wp

    # Layout plumbing (HBM side): zero-pad W -> W+2 so the kernel works entirely
    # in the wide row-stride-Wp form and every in-kernel store is lane-dense.
    x_wide = jnp.pad(x_nchw.astype(jnp.float32),
                     ((0, 0), (0, 0), (0, 0), (0, 2))).reshape(N, Cin, S)

    kernel = partial(_residual_conv_block_kernel, H=H, W=W)

    # Explicit VMEM budget: scratch + double-buffered in/out blocks + weights.
    pad_bytes = Cmax * (H + 3) * Wp * 4
    io_bytes = 2 * (Cin + Cout) * S * 4
    w_bytes = 2 * 4 * (9 * Cout * Cin + 27 * Cout * Cout + Cout * Cin + 5 * Cout)
    vmem_limit = int(min(96 * 2 ** 20,
                         max(16 * 2 ** 20, 2 * (pad_bytes + io_bytes + w_bytes))))

    out_wide = pl.pallas_call(
        kernel,
        out_shape=jax.ShapeDtypeStruct((N, Cout, S), jnp.float32),
        grid_spec=pltpu.PrefetchScalarGridSpec(
            num_scalar_prefetch=0,
            grid=(N,),
            in_specs=[
                pl.BlockSpec((1, Cin, S), lambda n: (n, 0, 0)),
                pl.BlockSpec((9, Cout, Cin), lambda n: (0, 0, 0)),
                pl.BlockSpec((Cout, 1), lambda n: (0, 0)),
                pl.BlockSpec((27, Cout, Cout), lambda n: (0, 0, 0)),
                pl.BlockSpec((3, Cout, 1), lambda n: (0, 0, 0)),
                pl.BlockSpec((Cout, Cin), lambda n: (0, 0)),
                pl.BlockSpec((Cout, 1), lambda n: (0, 0)),
            ],
            out_specs=pl.BlockSpec((1, Cout, S), lambda n: (n, 0, 0)),
            scratch_shapes=[
                pltpu.VMEM((Cmax, (H + 3) * Wp), jnp.float32),  # padded activation
            ],
        ),
        compiler_params=pltpu.CompilerParams(
            dimension_semantics=("parallel",),
            vmem_limit_bytes=vmem_limit),
    )(x_wide, params["w0"], params["b0"], params["wrest"], params["brest"],
      params["wr"], params["br"])

    # Layout plumbing: drop the 2 pad columns per row.
    return out_wide.reshape(N, Cout, H, Wp)[:, :, :, :W]


# --------------------- Deterministic parameter init -------------------------

def init_params(key, c_in, c_out, k_size=3, conv_layers=4):
    """Mimics nn.Conv2d default init (uniform +/- 1/sqrt(fan_in)) deterministically."""
    def conv_init(k, cout, cin, ksz):
        kw, kb = jax.random.split(k)
        bound = 1.0 / math.sqrt(cin * ksz * ksz)
        w = jax.random.uniform(kw, (cout, cin, ksz, ksz), jnp.float32, -bound, bound)
        b = jax.random.uniform(kb, (cout,), jnp.float32, -bound, bound)
        return w, b

    keys = jax.random.split(key, conv_layers + 1)
    ws, bs = [], []
    w, b = conv_init(keys[0], c_out, c_in, k_size)
    ws.append(w); bs.append(b)
    for i in range(1, conv_layers):
        w, b = conv_init(keys[i], c_out, c_out, k_size)
        ws.append(w); bs.append(b)
    wr, br = conv_init(keys[-1], c_out, c_in, 1)

    def to_taps(w_oihw):  # (Cout, Cin, 3, 3) -> (9, Cout, Cin), tap t = dy*3 + dx
        cout, cin, kh, kw_ = w_oihw.shape
        return jnp.transpose(w_oihw, (2, 3, 0, 1)).reshape(kh * kw_, cout, cin)

    return {
        # Torch-style (OIHW) weights kept for the pure-JAX reference.
        "torch_ws": ws, "torch_bs": bs, "torch_wr": wr, "torch_br": br,
        # Kernel-side packing (per-tap slabs).
        "w0": to_taps(ws[0]),                                    # (9, Cout, Cin)
        "b0": bs[0][:, None],                                    # (Cout, 1)
        "wrest": jnp.concatenate([to_taps(w) for w in ws[1:]]),  # (27, Cout, Cout)
        "brest": jnp.stack(bs[1:])[:, :, None],                  # (3, Cout, 1)
        "wr": wr[:, :, 0, 0],                                    # (Cout, Cin)
        "br": br[:, None],                                       # (Cout, 1)
    }


# ---------------------------- Pure-JAX reference ----------------------------

def _conv_nchw(x, w, b, pad):
    y = lax.conv_general_dilated(
        x, w, window_strides=(1, 1), padding=[(pad, pad), (pad, pad)],
        dimension_numbers=("NCHW", "OIHW", "NCHW"))
    return y + b[None, :, None, None]


def reference_forward(x, params):
    conv_out = x
    for w, b in zip(params["torch_ws"], params["torch_bs"]):
        conv_out = _conv_nchw(jnp.maximum(conv_out, 0.0), w, b, pad=1)
    res = _conv_nchw(x, params["torch_wr"], params["torch_br"], pad=0)
    # F.interpolate(res, scale_factor=1, mode='bilinear') is an identity.
    return res + conv_out


# --------------------------------- Main --------------------------------------

if __name__ == "__main__":
    key = jax.random.PRNGKey(0)
    kx, kp = jax.random.split(key)

    N, C_IN, C_OUT, H, W = 2, 4, 8, 16, 16
    x = jax.random.normal(kx, (N, C_IN, H, W), jnp.float32)
    params = init_params(kp, C_IN, C_OUT, k_size=3, conv_layers=4)

    out = jax.block_until_ready(residual_conv_block(x, params))
    ref = jax.block_until_ready(reference_forward(x, params))

    assert out.shape == (N, C_OUT, H, W), out.shape
    assert jnp.allclose(out, ref, rtol=1e-4, atol=1e-4), \
        f"max abs err = {jnp.max(jnp.abs(out - ref))}"

    print("KERNEL_OK")
</pallas_src>

<mosaic_0001>
module attributes {stable_mosaic.version = 11 : i64} {
  func.func @_residual_conv_block_kernel(%arg0: i32, %arg1: memref<1x4x288xf32, #tpu.memory_space<vmem>>, %arg2: memref<9x8x4xf32, #tpu.memory_space<vmem>>, %arg3: memref<8x1xf32, #tpu.memory_space<vmem>>, %arg4: memref<27x8x8xf32, #tpu.memory_space<vmem>>, %arg5: memref<3x8x1xf32, #tpu.memory_space<vmem>>, %arg6: memref<8x4xf32, #tpu.memory_space<vmem>>, %arg7: memref<8x1xf32, #tpu.memory_space<vmem>>, %arg8: memref<1x8x288xf32, #tpu.memory_space<vmem>>, %arg9: memref<8x342xf32, #tpu.memory_space<vmem>>) attributes {dimension_semantics = [#tpu.dimension_semantics<parallel>], iteration_bounds = array<i64: 2>, scalar_prefetch = 0 : i64, scratch_operands = 1 : i64, tpu.core_type = #tpu.core_type<tc>, window_params = [{transform_indices = @transform_0, window_bounds = array<i64: 1, 4, 288>}, {pipeline_mode = #tpu.pipeline_mode<synchronous>, transform_indices = @transform_1, window_bounds = array<i64: 9, 8, 4>}, {pipeline_mode = #tpu.pipeline_mode<synchronous>, transform_indices = @transform_2, window_bounds = array<i64: 8, 1>}, {pipeline_mode = #tpu.pipeline_mode<synchronous>, transform_indices = @transform_3, window_bounds = array<i64: 27, 8, 8>}, {pipeline_mode = #tpu.pipeline_mode<synchronous>, transform_indices = @transform_4, window_bounds = array<i64: 3, 8, 1>}, {pipeline_mode = #tpu.pipeline_mode<synchronous>, transform_indices = @transform_5, window_bounds = array<i64: 8, 4>}, {pipeline_mode = #tpu.pipeline_mode<synchronous>, transform_indices = @transform_6, window_bounds = array<i64: 8, 1>}, {transform_indices = @transform_7, window_bounds = array<i64: 1, 8, 288>}]} {
    %cst = arith.constant 0.000000e+00 : f32
    %0 = vector.broadcast %cst : f32 to vector<8x19xf32>
    %c0 = arith.constant 0 : index
    %c0_0 = arith.constant 0 : index
    %1 = vector.load %arg9[%c0, %c0_0] : memref<8x342xf32, #tpu.memory_space<vmem>>, vector<8x19xf32>
    tpu.vector_store %arg9[%c0, %c0_0], %0 {strides = array<i32>} : memref<8x342xf32, #tpu.memory_space<vmem>>, vector<8x19xf32>,
    %cst_1 = arith.constant 0.000000e+00 : f32
    %2 = vector.broadcast %cst_1 : f32 to vector<8x35xf32>
    %c0_2 = arith.constant 0 : index
    %c307 = arith.constant 307 : index
    %3 = vector.load %arg9[%c0_2, %c307] : memref<8x342xf32, #tpu.memory_space<vmem>>, vector<8x35xf32>
    tpu.vector_store %arg9[%c0_2, %c307], %2 {strides = array<i32>} : memref<8x342xf32, #tpu.memory_space<vmem>>, vector<8x35xf32>,
    %c0_3 = arith.constant 0 : index
    %c0_4 = arith.constant 0 : index
    %c0_5 = arith.constant 0 : index
    %4 = vector.load %arg1[%c0_3, %c0_4, %c0_5] : memref<1x4x288xf32, #tpu.memory_space<vmem>>, vector<1x4x288xf32>
    %5 = vector.shape_cast %4 : vector<1x4x288xf32> to vector<4x288xf32>
    %cst_6 = arith.constant 0.000000e+00 : f32
    %6 = vector.broadcast %cst_6 : f32 to vector<4x288xf32>
    %7 = arith.maximumf %5, %6 : vector<4x288xf32>
    %c0_7 = arith.constant 0 : index
    %c19 = arith.constant 19 : index
    %8 = vector.load %arg9[%c0_7, %c19] : memref<8x342xf32, #tpu.memory_space<vmem>>, vector<4x288xf32>
    tpu.vector_store %arg9[%c0_7, %c19], %7 {strides = array<i32>} : memref<8x342xf32, #tpu.memory_space<vmem>>, vector<4x288xf32>,
    %c0_8 = arith.constant 0 : index
    %c0_9 = arith.constant 0 : index
    %9 = vector.load %arg3[%c0_8, %c0_9] : memref<8x1xf32, #tpu.memory_space<vmem>>, vector<8x1xf32>
    %c0_10 = arith.constant 0 : index
    %c0_11 = arith.constant 0 : index
    %c0_12 = arith.constant 0 : index
    %10 = vector.load %arg2[%c0_10, %c0_11, %c0_12] : memref<9x8x4xf32, #tpu.memory_space<vmem>>, vector<1x8x4xf32>
    %11 = vector.shape_cast %10 : vector<1x8x4xf32> to vector<8x4xf32>
    %c0_13 = arith.constant 0 : index
    %c0_14 = arith.constant 0 : index
    %12 = vector.load %arg9[%c0_13, %c0_14] : memref<8x342xf32, #tpu.memory_space<vmem>>, vector<4x288xf32>
    %cst_15 = arith.constant dense<0.000000e+00> : vector<8x288xf32>
    %13 = tpu.matmul %11, %12, %cst_15 {dimension_numbers = #tpu.dot_dimension_numbers<[1], [0], [0], [1], [0, 0, 1, 1], [], []>} : vector<8x4xf32>, vector<4x288xf32>, vector<8x288xf32> -> vector<8x288xf32>
    %c1 = arith.constant 1 : index
    %c0_16 = arith.constant 0 : index
    %c0_17 = arith.constant 0 : index
    %14 = vector.load %arg2[%c1, %c0_16, %c0_17] : memref<9x8x4xf32, #tpu.memory_space<vmem>>, vector<1x8x4xf32>
    %15 = vector.shape_cast %14 : vector<1x8x4xf32> to vector<8x4xf32>
    %c0_18 = arith.constant 0 : index
    %c1_19 = arith.constant 1 : index
    %16 = vector.load %arg9[%c0_18, %c1_19] : memref<8x342xf32, #tpu.memory_space<vmem>>, vector<4x288xf32>
    %cst_20 = arith.constant dense<0.000000e+00> : vector<8x288xf32>
    %17 = tpu.matmul %15, %16, %cst_20 {dimension_numbers = #tpu.dot_dimension_numbers<[1], [0], [0], [1], [0, 0, 1, 1], [], []>} : vector<8x4xf32>, vector<4x288xf32>, vector<8x288xf32> -> vector<8x288xf32>
    %18 = arith.addf %13, %17 : vector<8x288xf32>
    %c2 = arith.constant 2 : index
    %c0_21 = arith.constant 0 : index
    %c0_22 = arith.constant 0 : index
    %19 = vector.load %arg2[%c2, %c0_21, %c0_22] : memref<9x8x4xf32, #tpu.memory_space<vmem>>, vector<1x8x4xf32>
    %20 = vector.shape_cast %19 : vector<1x8x4xf32> to vector<8x4xf32>
    %c0_23 = arith.constant 0 : index
    %c2_24 = arith.constant 2 : index
    %21 = vector.load %arg9[%c0_23, %c2_24] : memref<8x342xf32, #tpu.memory_space<vmem>>, vector<4x288xf32>
    %cst_25 = arith.constant dense<0.000000e+00> : vector<8x288xf32>
    %22 = tpu.matmul %20, %21, %cst_25 {dimension_numbers = #tpu.dot_dimension_numbers<[1], [0], [0], [1], [0, 0, 1, 1], [], []>} : vector<8x4xf32>, vector<4x288xf32>, vector<8x288xf32> -> vector<8x288xf32>
    %23 = arith.addf %18, %22 : vector<8x288xf32>
    %c3 = arith.constant 3 : index
    %c0_26 = arith.constant 0 : index
    %c0_27 = arith.constant 0 : index
    %24 = vector.load %arg2[%c3, %c0_26, %c0_27] : memref<9x8x4xf32, #tpu.memory_space<vmem>>, vector<1x8x4xf32>
    %25 = vector.shape_cast %24 : vector<1x8x4xf32> to vector<8x4xf32>
    %c0_28 = arith.constant 0 : index
    %c18 = arith.constant 18 : index
    %26 = vector.load %arg9[%c0_28, %c18] : memref<8x342xf32, #tpu.memory_space<vmem>>, vector<4x288xf32>
    %cst_29 = arith.constant dense<0.000000e+00> : vector<8x288xf32>
    %27 = tpu.matmul %25, %26, %cst_29 {dimension_numbers = #tpu.dot_dimension_numbers<[1], [0], [0], [1], [0, 0, 1, 1], [], []>} : vector<8x4xf32>, vector<4x288xf32>, vector<8x288xf32> -> vector<8x288xf32>
    %28 = arith.addf %23, %27 : vector<8x288xf32>
    %c4 = arith.constant 4 : index
    %c0_30 = arith.constant 0 : index
    %c0_31 = arith.constant 0 : index
    %29 = vector.load %arg2[%c4, %c0_30, %c0_31] : memref<9x8x4xf32, #tpu.memory_space<vmem>>, vector<1x8x4xf32>
    %30 = vector.shape_cast %29 : vector<1x8x4xf32> to vector<8x4xf32>
    %c0_32 = arith.constant 0 : index
    %c19_33 = arith.constant 19 : index
    %31 = vector.load %arg9[%c0_32, %c19_33] : memref<8x342xf32, #tpu.memory_space<vmem>>, vector<4x288xf32>
    %cst_34 = arith.constant dense<0.000000e+00> : vector<8x288xf32>
    %32 = tpu.matmul %30, %31, %cst_34 {dimension_numbers = #tpu.dot_dimension_numbers<[1], [0], [0], [1], [0, 0, 1, 1], [], []>} : vector<8x4xf32>, vector<4x288xf32>, vector<8x288xf32> -> vector<8x288xf32>
    %33 = arith.addf %28, %32 : vector<8x288xf32>
    %c5 = arith.constant 5 : index
    %c0_35 = arith.constant 0 : index
    %c0_36 = arith.constant 0 : index
    %34 = vector.load %arg2[%c5, %c0_35, %c0_36] : memref<9x8x4xf32, #tpu.memory_space<vmem>>, vector<1x8x4xf32>
    %35 = vector.shape_cast %34 : vector<1x8x4xf32> to vector<8x4xf32>
    %c0_37 = arith.constant 0 : index
    %c20 = arith.constant 20 : index
    %36 = vector.load %arg9[%c0_37, %c20] : memref<8x342xf32, #tpu.memory_space<vmem>>, vector<4x288xf32>
    %cst_38 = arith.constant dense<0.000000e+00> : vector<8x288xf32>
    %37 = tpu.matmul %35, %36, %cst_38 {dimension_numbers = #tpu.dot_dimension_numbers<[1], [0], [0], [1], [0, 0, 1, 1], [], []>} : vector<8x4xf32>, vector<4x288xf32>, vector<8x288xf32> -> vector<8x288xf32>
    %38 = arith.addf %33, %37 : vector<8x288xf32>
    %c6 = arith.constant 6 : index
    %c0_39 = arith.constant 0 : index
    %c0_40 = arith.constant 0 : index
    %39 = vector.load %arg2[%c6, %c0_39, %c0_40] : memref<9x8x4xf32, #tpu.memory_space<vmem>>, vector<1x8x4xf32>
    %40 = vector.shape_cast %39 : vector<1x8x4xf32> to vector<8x4xf32>
    %c0_41 = arith.constant 0 : index
    %c36 = arith.constant 36 : index
    %41 = vector.load %arg9[%c0_41, %c36] : memref<8x342xf32, #tpu.memory_space<vmem>>, vector<4x288xf32>
    %cst_42 = arith.constant dense<0.000000e+00> : vector<8x288xf32>
    %42 = tpu.matmul %40, %41, %cst_42 {dimension_numbers = #tpu.dot_dimension_numbers<[1], [0], [0], [1], [0, 0, 1, 1], [], []>} : vector<8x4xf32>, vector<4x288xf32>, vector<8x288xf32> -> vector<8x288xf32>
    %43 = arith.addf %38, %42 : vector<8x288xf32>
    %c7 = arith.constant 7 : index
    %c0_43 = arith.constant 0 : index
    %c0_44 = arith.constant 0 : index
    %44 = vector.load %arg2[%c7, %c0_43, %c0_44] : memref<9x8x4xf32, #tpu.memory_space<vmem>>, vector<1x8x4xf32>
    %45 = vector.shape_cast %44 : vector<1x8x4xf32> to vector<8x4xf32>
    %c0_45 = arith.constant 0 : index
    %c37 = arith.constant 37 : index
    %46 = vector.load %arg9[%c0_45, %c37] : memref<8x342xf32, #tpu.memory_space<vmem>>, vector<4x288xf32>
    %cst_46 = arith.constant dense<0.000000e+00> : vector<8x288xf32>
    %47 = tpu.matmul %45, %46, %cst_46 {dimension_numbers = #tpu.dot_dimension_numbers<[1], [0], [0], [1], [0, 0, 1, 1], [], []>} : vector<8x4xf32>, vector<4x288xf32>, vector<8x288xf32> -> vector<8x288xf32>
    %48 = arith.addf %43, %47 : vector<8x288xf32>
    %c8 = arith.constant 8 : index
    %c0_47 = arith.constant 0 : index
    %c0_48 = arith.constant 0 : index
    %49 = vector.load %arg2[%c8, %c0_47, %c0_48] : memref<9x8x4xf32, #tpu.memory_space<vmem>>, vector<1x8x4xf32>
    %50 = vector.shape_cast %49 : vector<1x8x4xf32> to vector<8x4xf32>
    %c0_49 = arith.constant 0 : index
    %c38 = arith.constant 38 : index
    %51 = vector.load %arg9[%c0_49, %c38] : memref<8x342xf32, #tpu.memory_space<vmem>>, vector<4x288xf32>
    %cst_50 = arith.constant dense<0.000000e+00> : vector<8x288xf32>
    %52 = tpu.matmul %50, %51, %cst_50 {dimension_numbers = #tpu.dot_dimension_numbers<[1], [0], [0], [1], [0, 0, 1, 1], [], []>} : vector<8x4xf32>, vector<4x288xf32>, vector<8x288xf32> -> vector<8x288xf32>
    %53 = arith.addf %48, %52 : vector<8x288xf32>
    %54 = vector.broadcast %9 : vector<8x1xf32> to vector<8x288xf32>
    %55 = arith.addf %53, %54 : vector<8x288xf32>
    %56 = tpu.iota {dimensions = array<i32: 1>} : vector<1x288xi32>
    %c18_i32 = arith.constant 18 : i32
    %c0_i32 = arith.constant 0 : i32
    %57 = arith.cmpi eq, %c18_i32, %c0_i32 : i32
    %c1_i32 = arith.constant 1 : i32
    %58 = arith.select %57, %c1_i32, %c18_i32 : i32
    %59 = vector.broadcast %58 : i32 to vector<1x288xi32>
    %60 = arith.remsi %56, %59 : vector<1x288xi32>
    %c0_i32_51 = arith.constant 0 : i32
    %61 = vector.broadcast %c0_i32_51 : i32 to vector<1x288xi32>
    %62 = arith.cmpi ne, %60, %61 : vector<1x288xi32>
    %c0_i32_52 = arith.constant 0 : i32
    %63 = vector.broadcast %c0_i32_52 : i32 to vector<1x288xi32>
    %64 = arith.cmpi slt, %60, %63 : vector<1x288xi32>
    %c0_i32_53 = arith.constant 0 : i32
    %65 = arith.cmpi slt, %58, %c0_i32_53 : i32
    %66 = vector.broadcast %65 : i1 to vector<1x288xi1>
    %67 = vector.broadcast %66 : vector<1x288xi1> to vector<1x288xi1>
    %68 = arith.xori %64, %67 : vector<1x288xi1>
    %69 = arith.andi %68, %62 : vector<1x288xi1>
    %70 = vector.broadcast %58 : i32 to vector<1x288xi32>
    %71 = arith.addi %60, %70 : vector<1x288xi32>
    %72 = arith.select %69, %71, %60 : vector<1x288xi1>, vector<1x288xi32>
    %c16_i32 = arith.constant 16 : i32
    %73 = vector.broadcast %c16_i32 : i32 to vector<1x288xi32>
    %74 = arith.cmpi slt, %72, %73 : vector<1x288xi32>
    %cst_54 = arith.constant 0.000000e+00 : f32
    %75 = vector.broadcast %cst_54 : f32 to vector<8x288xf32>
    %76 = arith.maximumf %55, %75 : vector<8x288xf32>
    %cst_55 = arith.constant 0.000000e+00 : f32
    %77 = vector.shape_cast %74 : vector<1x288xi1> to vector<1x288xi1>
    %78 = vector.broadcast %77 : vector<1x288xi1> to vector<8x288xi1>
    %79 = vector.broadcast %cst_55 : f32 to vector<8x288xf32>
    %80 = arith.select %78, %76, %79 : vector<8x288xi1>, vector<8x288xf32>
    %c0_56 = arith.constant 0 : index
    %c19_57 = arith.constant 19 : index
    %81 = vector.load %arg9[%c0_56, %c19_57] : memref<8x342xf32, #tpu.memory_space<vmem>>, vector<8x288xf32>
    tpu.vector_store %arg9[%c0_56, %c19_57], %80 {strides = array<i32>} : memref<8x342xf32, #tpu.memory_space<vmem>>, vector<8x288xf32>,
    %c0_58 = arith.constant 0 : index
    %c0_59 = arith.constant 0 : index
    %c0_60 = arith.constant 0 : index
    %82 = vector.load %arg5[%c0_58, %c0_59, %c0_60] : memref<3x8x1xf32, #tpu.memory_space<vmem>>, vector<1x8x1xf32>
    %83 = vector.shape_cast %82 : vector<1x8x1xf32> to vector<8x1xf32>
    %c0_61 = arith.constant 0 : index
    %c0_62 = arith.constant 0 : index
    %c0_63 = arith.constant 0 : index
    %84 = vector.load %arg4[%c0_61, %c0_62, %c0_63] : memref<27x8x8xf32, #tpu.memory_space<vmem>>, vector<1x8x8xf32>
    %85 = vector.shape_cast %84 : vector<1x8x8xf32> to vector<8x8xf32>
    %c0_64 = arith.constant 0 : index
    %c0_65 = arith.constant 0 : index
    %86 = vector.load %arg9[%c0_64, %c0_65] : memref<8x342xf32, #tpu.memory_space<vmem>>, vector<8x288xf32>
    %cst_66 = arith.constant dense<0.000000e+00> : vector<8x288xf32>
    %87 = tpu.matmul %85, %86, %cst_66 {dimension_numbers = #tpu.dot_dimension_numbers<[1], [0], [0], [1], [0, 0, 1, 1], [], []>} : vector<8x8xf32>, vector<8x288xf32>, vector<8x288xf32> -> vector<8x288xf32>
    %c1_67 = arith.constant 1 : index
    %c0_68 = arith.constant 0 : index
    %c0_69 = arith.constant 0 : index
    %88 = vector.load %arg4[%c1_67, %c0_68, %c0_69] : memref<27x8x8xf32, #tpu.memory_space<vmem>>, vector<1x8x8xf32>
    %89 = vector.shape_cast %88 : vector<1x8x8xf32> to vector<8x8xf32>
    %c0_70 = arith.constant 0 : index
    %c1_71 = arith.constant 1 : index
    %90 = vector.load %arg9[%c0_70, %c1_71] : memref<8x342xf32, #tpu.memory_space<vmem>>, vector<8x288xf32>
    %cst_72 = arith.constant dense<0.000000e+00> : vector<8x288xf32>
    %91 = tpu.matmul %89, %90, %cst_72 {dimension_numbers = #tpu.dot_dimension_numbers<[1], [0], [0], [1], [0, 0, 1, 1], [], []>} : vector<8x8xf32>, vector<8x288xf32>, vector<8x288xf32> -> vector<8x288xf32>
    %92 = arith.addf %87, %91 : vector<8x288xf32>
    %c2_73 = arith.constant 2 : index
    %c0_74 = arith.constant 0 : index
    %c0_75 = arith.constant 0 : index
    %93 = vector.load %arg4[%c2_73, %c0_74, %c0_75] : memref<27x8x8xf32, #tpu.memory_space<vmem>>, vector<1x8x8xf32>
    %94 = vector.shape_cast %93 : vector<1x8x8xf32> to vector<8x8xf32>
    %c0_76 = arith.constant 0 : index
    %c2_77 = arith.constant 2 : index
    %95 = vector.load %arg9[%c0_76, %c2_77] : memref<8x342xf32, #tpu.memory_space<vmem>>, vector<8x288xf32>
    %cst_78 = arith.constant dense<0.000000e+00> : vector<8x288xf32>
    %96 = tpu.matmul %94, %95, %cst_78 {dimension_numbers = #tpu.dot_dimension_numbers<[1], [0], [0], [1], [0, 0, 1, 1], [], []>} : vector<8x8xf32>, vector<8x288xf32>, vector<8x288xf32> -> vector<8x288xf32>
    %97 = arith.addf %92, %96 : vector<8x288xf32>
    %c3_79 = arith.constant 3 : index
    %c0_80 = arith.constant 0 : index
    %c0_81 = arith.constant 0 : index
    %98 = vector.load %arg4[%c3_79, %c0_80, %c0_81] : memref<27x8x8xf32, #tpu.memory_space<vmem>>, vector<1x8x8xf32>
    %99 = vector.shape_cast %98 : vector<1x8x8xf32> to vector<8x8xf32>
    %c0_82 = arith.constant 0 : index
    %c18_83 = arith.constant 18 : index
    %100 = vector.load %arg9[%c0_82, %c18_83] : memref<8x342xf32, #tpu.memory_space<vmem>>, vector<8x288xf32>
    %cst_84 = arith.constant dense<0.000000e+00> : vector<8x288xf32>
    %101 = tpu.matmul %99, %100, %cst_84 {dimension_numbers = #tpu.dot_dimension_numbers<[1], [0], [0], [1], [0, 0, 1, 1], [], []>} : vector<8x8xf32>, vector<8x288xf32>, vector<8x288xf32> -> vector<8x288xf32>
    %102 = arith.addf %97, %101 : vector<8x288xf32>
    %c4_85 = arith.constant 4 : index
    %c0_86 = arith.constant 0 : index
    %c0_87 = arith.constant 0 : index
    %103 = vector.load %arg4[%c4_85, %c0_86, %c0_87] : memref<27x8x8xf32, #tpu.memory_space<vmem>>, vector<1x8x8xf32>
    %104 = vector.shape_cast %103 : vector<1x8x8xf32> to vector<8x8xf32>
    %c0_88 = arith.constant 0 : index
    %c19_89 = arith.constant 19 : index
    %105 = vector.load %arg9[%c0_88, %c19_89] : memref<8x342xf32, #tpu.memory_space<vmem>>, vector<8x288xf32>
    %cst_90 = arith.constant dense<0.000000e+00> : vector<8x288xf32>
    %106 = tpu.matmul %104, %105, %cst_90 {dimension_numbers = #tpu.dot_dimension_numbers<[1], [0], [0], [1], [0, 0, 1, 1], [], []>} : vector<8x8xf32>, vector<8x288xf32>, vector<8x288xf32> -> vector<8x288xf32>
    %107 = arith.addf %102, %106 : vector<8x288xf32>
    %c5_91 = arith.constant 5 : index
    %c0_92 = arith.constant 0 : index
    %c0_93 = arith.constant 0 : index
    %108 = vector.load %arg4[%c5_91, %c0_92, %c0_93] : memref<27x8x8xf32, #tpu.memory_space<vmem>>, vector<1x8x8xf32>
    %109 = vector.shape_cast %108 : vector<1x8x8xf32> to vector<8x8xf32>
    %c0_94 = arith.constant 0 : index
    %c20_95 = arith.constant 20 : index
    %110 = vector.load %arg9[%c0_94, %c20_95] : memref<8x342xf32, #tpu.memory_space<vmem>>, vector<8x288xf32>
    %cst_96 = arith.constant dense<0.000000e+00> : vector<8x288xf32>
    %111 = tpu.matmul %109, %110, %cst_96 {dimension_numbers = #tpu.dot_dimension_numbers<[1], [0], [0], [1], [0, 0, 1, 1], [], []>} : vector<8x8xf32>, vector<8x288xf32>, vector<8x288xf32> -> vector<8x288xf32>
    %112 = arith.addf %107, %111 : vector<8x288xf32>
    %c6_97 = arith.constant 6 : index
    %c0_98 = arith.constant 0 : index
    %c0_99 = arith.constant 0 : index
    %113 = vector.load %arg4[%c6_97, %c0_98, %c0_99] : memref<27x8x8xf32, #tpu.memory_space<vmem>>, vector<1x8x8xf32>
    %114 = vector.shape_cast %113 : vector<1x8x8xf32> to vector<8x8xf32>
    %c0_100 = arith.constant 0 : index
    %c36_101 = arith.constant 36 : index
    %115 = vector.load %arg9[%c0_100, %c36_101] : memref<8x342xf32, #tpu.memory_space<vmem>>, vector<8x288xf32>
    %cst_102 = arith.constant dense<0.000000e+00> : vector<8x288xf32>
    %116 = tpu.matmul %114, %115, %cst_102 {dimension_numbers = #tpu.dot_dimension_numbers<[1], [0], [0], [1], [0, 0, 1, 1], [], []>} : vector<8x8xf32>, vector<8x288xf32>, vector<8x288xf32> -> vector<8x288xf32>
    %117 = arith.addf %112, %116 : vector<8x288xf32>
    %c7_103 = arith.constant 7 : index
    %c0_104 = arith.constant 0 : index
    %c0_105 = arith.constant 0 : index
    %118 = vector.load %arg4[%c7_103, %c0_104, %c0_105] : memref<27x8x8xf32, #tpu.memory_space<vmem>>, vector<1x8x8xf32>
    %119 = vector.shape_cast %118 : vector<1x8x8xf32> to vector<8x8xf32>
    %c0_106 = arith.constant 0 : index
    %c37_107 = arith.constant 37 : index
    %120 = vector.load %arg9[%c0_106, %c37_107] : memref<8x342xf32, #tpu.memory_space<vmem>>, vector<8x288xf32>
    %cst_108 = arith.constant dense<0.000000e+00> : vector<8x288xf32>
    %121 = tpu.matmul %119, %120, %cst_108 {dimension_numbers = #tpu.dot_dimension_numbers<[1], [0], [0], [1], [0, 0, 1, 1], [], []>} : vector<8x8xf32>, vector<8x288xf32>, vector<8x288xf32> -> vector<8x288xf32>
    %122 = arith.addf %117, %121 : vector<8x288xf32>
    %c8_109 = arith.constant 8 : index
    %c0_110 = arith.constant 0 : index
    %c0_111 = arith.constant 0 : index
    %123 = vector.load %arg4[%c8_109, %c0_110, %c0_111] : memref<27x8x8xf32, #tpu.memory_space<vmem>>, vector<1x8x8xf32>
    %124 = vector.shape_cast %123 : vector<1x8x8xf32> to vector<8x8xf32>
    %c0_112 = arith.constant 0 : index
    %c38_113 = arith.constant 38 : index
    %125 = vector.load %arg9[%c0_112, %c38_113] : memref<8x342xf32, #tpu.memory_space<vmem>>, vector<8x288xf32>
    %cst_114 = arith.constant dense<0.000000e+00> : vector<8x288xf32>
    %126 = tpu.matmul %124, %125, %cst_114 {dimension_numbers = #tpu.dot_dimension_numbers<[1], [0], [0], [1], [0, 0, 1, 1], [], []>} : vector<8x8xf32>, vector<8x288xf32>, vector<8x288xf32> -> vector<8x288xf32>
    %127 = arith.addf %122, %126 : vector<8x288xf32>
    %128 = vector.broadcast %83 : vector<8x1xf32> to vector<8x288xf32>
    %129 = arith.addf %127, %128 : vector<8x288xf32>
    %cst_115 = arith.constant 0.000000e+00 : f32
    %130 = vector.broadcast %cst_115 : f32 to vector<8x288xf32>
    %131 = arith.maximumf %129, %130 : vector<8x288xf32>
    %cst_116 = arith.constant 0.000000e+00 : f32
    %132 = vector.shape_cast %74 : vector<1x288xi1> to vector<1x288xi1>
    %133 = vector.broadcast %132 : vector<1x288xi1> to vector<8x288xi1>
    %134 = vector.broadcast %cst_116 : f32 to vector<8x288xf32>
    %135 = arith.select %133, %131, %134 : vector<8x288xi1>, vector<8x288xf32>
    %c0_117 = arith.constant 0 : index
    %c19_118 = arith.constant 19 : index
    %136 = vector.load %arg9[%c0_117, %c19_118] : memref<8x342xf32, #tpu.memory_space<vmem>>, vector<8x288xf32>
    tpu.vector_store %arg9[%c0_117, %c19_118], %135 {strides = array<i32>} : memref<8x342xf32, #tpu.memory_space<vmem>>, vector<8x288xf32>,
    %c1_119 = arith.constant 1 : index
    %c0_120 = arith.constant 0 : index
    %c0_121 = arith.constant 0 : index
    %137 = vector.load %arg5[%c1_119, %c0_120, %c0_121] : memref<3x8x1xf32, #tpu.memory_space<vmem>>, vector<1x8x1xf32>
    %138 = vector.shape_cast %137 : vector<1x8x1xf32> to vector<8x1xf32>
    %c9 = arith.constant 9 : index
    %c0_122 = arith.constant 0 : index
    %c0_123 = arith.constant 0 : index
    %139 = vector.load %arg4[%c9, %c0_122, %c0_123] : memref<27x8x8xf32, #tpu.memory_space<vmem>>, vector<1x8x8xf32>
    %140 = vector.shape_cast %139 : vector<1x8x8xf32> to vector<8x8xf32>
    %c0_124 = arith.constant 0 : index
    %c0_125 = arith.constant 0 : index
    %141 = vector.load %arg9[%c0_124, %c0_125] : memref<8x342xf32, #tpu.memory_space<vmem>>, vector<8x288xf32>
    %cst_126 = arith.constant dense<0.000000e+00> : vector<8x288xf32>
    %142 = tpu.matmul %140, %141, %cst_126 {dimension_numbers = #tpu.dot_dimension_numbers<[1], [0], [0], [1], [0, 0, 1, 1], [], []>} : vector<8x8xf32>, vector<8x288xf32>, vector<8x288xf32> -> vector<8x288xf32>
    %c10 = arith.constant 10 : index
    %c0_127 = arith.constant 0 : index
    %c0_128 = arith.constant 0 : index
    %143 = vector.load %arg4[%c10, %c0_127, %c0_128] : memref<27x8x8xf32, #tpu.memory_space<vmem>>, vector<1x8x8xf32>
    %144 = vector.shape_cast %143 : vector<1x8x8xf32> to vector<8x8xf32>
    %c0_129 = arith.constant 0 : index
    %c1_130 = arith.constant 1 : index
    %145 = vector.load %arg9[%c0_129, %c1_130] : memref<8x342xf32, #tpu.memory_space<vmem>>, vector<8x288xf32>
    %cst_131 = arith.constant dense<0.000000e+00> : vector<8x288xf32>
    %146 = tpu.matmul %144, %145, %cst_131 {dimension_numbers = #tpu.dot_dimension_numbers<[1], [0], [0], [1], [0, 0, 1, 1], [], []>} : vector<8x8xf32>, vector<8x288xf32>, vector<8x288xf32> -> vector<8x288xf32>
    %147 = arith.addf %142, %146 : vector<8x288xf32>
    %c11 = arith.constant 11 : index
    %c0_132 = arith.constant 0 : index
    %c0_133 = arith.constant 0 : index
    %148 = vector.load %arg4[%c11, %c0_132, %c0_133] : memref<27x8x8xf32, #tpu.memory_space<vmem>>, vector<1x8x8xf32>
    %149 = vector.shape_cast %148 : vector<1x8x8xf32> to vector<8x8xf32>
    %c0_134 = arith.constant 0 : index
    %c2_135 = arith.constant 2 : index
    %150 = vector.load %arg9[%c0_134, %c2_135] : memref<8x342xf32, #tpu.memory_space<vmem>>, vector<8x288xf32>
    %cst_136 = arith.constant dense<0.000000e+00> : vector<8x288xf32>
    %151 = tpu.matmul %149, %150, %cst_136 {dimension_numbers = #tpu.dot_dimension_numbers<[1], [0], [0], [1], [0, 0, 1, 1], [], []>} : vector<8x8xf32>, vector<8x288xf32>, vector<8x288xf32> -> vector<8x288xf32>
    %152 = arith.addf %147, %151 : vector<8x288xf32>
    %c12 = arith.constant 12 : index
    %c0_137 = arith.constant 0 : index
    %c0_138 = arith.constant 0 : index
    %153 = vector.load %arg4[%c12, %c0_137, %c0_138] : memref<27x8x8xf32, #tpu.memory_space<vmem>>, vector<1x8x8xf32>
    %154 = vector.shape_cast %153 : vector<1x8x8xf32> to vector<8x8xf32>
    %c0_139 = arith.constant 0 : index
    %c18_140 = arith.constant 18 : index
    %155 = vector.load %arg9[%c0_139, %c18_140] : memref<8x342xf32, #tpu.memory_space<vmem>>, vector<8x288xf32>
    %cst_141 = arith.constant dense<0.000000e+00> : vector<8x288xf32>
    %156 = tpu.matmul %154, %155, %cst_141 {dimension_numbers = #tpu.dot_dimension_numbers<[1], [0], [0], [1], [0, 0, 1, 1], [], []>} : vector<8x8xf32>, vector<8x288xf32>, vector<8x288xf32> -> vector<8x288xf32>
    %157 = arith.addf %152, %156 : vector<8x288xf32>
    %c13 = arith.constant 13 : index
    %c0_142 = arith.constant 0 : index
    %c0_143 = arith.constant 0 : index
    %158 = vector.load %arg4[%c13, %c0_142, %c0_143] : memref<27x8x8xf32, #tpu.memory_space<vmem>>, vector<1x8x8xf32>
    %159 = vector.shape_cast %158 : vector<1x8x8xf32> to vector<8x8xf32>
    %c0_144 = arith.constant 0 : index
    %c19_145 = arith.constant 19 : index
    %160 = vector.load %arg9[%c0_144, %c19_145] : memref<8x342xf32, #tpu.memory_space<vmem>>, vector<8x288xf32>
    %cst_146 = arith.constant dense<0.000000e+00> : vector<8x288xf32>
    %161 = tpu.matmul %159, %160, %cst_146 {dimension_numbers = #tpu.dot_dimension_numbers<[1], [0], [0], [1], [0, 0, 1, 1], [], []>} : vector<8x8xf32>, vector<8x288xf32>, vector<8x288xf32> -> vector<8x288xf32>
    %162 = arith.addf %157, %161 : vector<8x288xf32>
    %c14 = arith.constant 14 : index
    %c0_147 = arith.constant 0 : index
    %c0_148 = arith.constant 0 : index
    %163 = vector.load %arg4[%c14, %c0_147, %c0_148] : memref<27x8x8xf32, #tpu.memory_space<vmem>>, vector<1x8x8xf32>
    %164 = vector.shape_cast %163 : vector<1x8x8xf32> to vector<8x8xf32>
    %c0_149 = arith.constant 0 : index
    %c20_150 = arith.constant 20 : index
    %165 = vector.load %arg9[%c0_149, %c20_150] : memref<8x342xf32, #tpu.memory_space<vmem>>, vector<8x288xf32>
    %cst_151 = arith.constant dense<0.000000e+00> : vector<8x288xf32>
    %166 = tpu.matmul %164, %165, %cst_151 {dimension_numbers = #tpu.dot_dimension_numbers<[1], [0], [0], [1], [0, 0, 1, 1], [], []>} : vector<8x8xf32>, vector<8x288xf32>, vector<8x288xf32> -> vector<8x288xf32>
    %167 = arith.addf %162, %166 : vector<8x288xf32>
    %c15 = arith.constant 15 : index
    %c0_152 = arith.constant 0 : index
    %c0_153 = arith.constant 0 : index
    %168 = vector.load %arg4[%c15, %c0_152, %c0_153] : memref<27x8x8xf32, #tpu.memory_space<vmem>>, vector<1x8x8xf32>
    %169 = vector.shape_cast %168 : vector<1x8x8xf32> to vector<8x8xf32>
    %c0_154 = arith.constant 0 : index
    %c36_155 = arith.constant 36 : index
    %170 = vector.load %arg9[%c0_154, %c36_155] : memref<8x342xf32, #tpu.memory_space<vmem>>, vector<8x288xf32>
    %cst_156 = arith.constant dense<0.000000e+00> : vector<8x288xf32>
    %171 = tpu.matmul %169, %170, %cst_156 {dimension_numbers = #tpu.dot_dimension_numbers<[1], [0], [0], [1], [0, 0, 1, 1], [], []>} : vector<8x8xf32>, vector<8x288xf32>, vector<8x288xf32> -> vector<8x288xf32>
    %172 = arith.addf %167, %171 : vector<8x288xf32>
    %c16 = arith.constant 16 : index
    %c0_157 = arith.constant 0 : index
    %c0_158 = arith.constant 0 : index
    %173 = vector.load %arg4[%c16, %c0_157, %c0_158] : memref<27x8x8xf32, #tpu.memory_space<vmem>>, vector<1x8x8xf32>
    %174 = vector.shape_cast %173 : vector<1x8x8xf32> to vector<8x8xf32>
    %c0_159 = arith.constant 0 : index
    %c37_160 = arith.constant 37 : index
    %175 = vector.load %arg9[%c0_159, %c37_160] : memref<8x342xf32, #tpu.memory_space<vmem>>, vector<8x288xf32>
    %cst_161 = arith.constant dense<0.000000e+00> : vector<8x288xf32>
    %176 = tpu.matmul %174, %175, %cst_161 {dimension_numbers = #tpu.dot_dimension_numbers<[1], [0], [0], [1], [0, 0, 1, 1], [], []>} : vector<8x8xf32>, vector<8x288xf32>, vector<8x288xf32> -> vector<8x288xf32>
    %177 = arith.addf %172, %176 : vector<8x288xf32>
    %c17 = arith.constant 17 : index
    %c0_162 = arith.constant 0 : index
    %c0_163 = arith.constant 0 : index
    %178 = vector.load %arg4[%c17, %c0_162, %c0_163] : memref<27x8x8xf32, #tpu.memory_space<vmem>>, vector<1x8x8xf32>
    %179 = vector.shape_cast %178 : vector<1x8x8xf32> to vector<8x8xf32>
    %c0_164 = arith.constant 0 : index
    %c38_165 = arith.constant 38 : index
    %180 = vector.load %arg9[%c0_164, %c38_165] : memref<8x342xf32, #tpu.memory_space<vmem>>, vector<8x288xf32>
    %cst_166 = arith.constant dense<0.000000e+00> : vector<8x288xf32>
    %181 = tpu.matmul %179, %180, %cst_166 {dimension_numbers = #tpu.dot_dimension_numbers<[1], [0], [0], [1], [0, 0, 1, 1], [], []>} : vector<8x8xf32>, vector<8x288xf32>, vector<8x288xf32> -> vector<8x288xf32>
    %182 = arith.addf %177, %181 : vector<8x288xf32>
    %183 = vector.broadcast %138 : vector<8x1xf32> to vector<8x288xf32>
    %184 = arith.addf %182, %183 : vector<8x288xf32>
    %cst_167 = arith.constant 0.000000e+00 : f32
    %185 = vector.broadcast %cst_167 : f32 to vector<8x288xf32>
    %186 = arith.maximumf %184, %185 : vector<8x288xf32>
    %cst_168 = arith.constant 0.000000e+00 : f32
    %187 = vector.shape_cast %74 : vector<1x288xi1> to vector<1x288xi1>
    %188 = vector.broadcast %187 : vector<1x288xi1> to vector<8x288xi1>
    %189 = vector.broadcast %cst_168 : f32 to vector<8x288xf32>
    %190 = arith.select %188, %186, %189 : vector<8x288xi1>, vector<8x288xf32>
    %c0_169 = arith.constant 0 : index
    %c19_170 = arith.constant 19 : index
    %191 = vector.load %arg9[%c0_169, %c19_170] : memref<8x342xf32, #tpu.memory_space<vmem>>, vector<8x288xf32>
    tpu.vector_store %arg9[%c0_169, %c19_170], %190 {strides = array<i32>} : memref<8x342xf32, #tpu.memory_space<vmem>>, vector<8x288xf32>,
    %c2_171 = arith.constant 2 : index
    %c0_172 = arith.constant 0 : index
    %c0_173 = arith.constant 0 : index
    %192 = vector.load %arg5[%c2_171, %c0_172, %c0_173] : memref<3x8x1xf32, #tpu.memory_space<vmem>>, vector<1x8x1xf32>
    %193 = vector.shape_cast %192 : vector<1x8x1xf32> to vector<8x1xf32>
    %c18_174 = arith.constant 18 : index
    %c0_175 = arith.constant 0 : index
    %c0_176 = arith.constant 0 : index
    %194 = vector.load %arg4[%c18_174, %c0_175, %c0_176] : memref<27x8x8xf32, #tpu.memory_space<vmem>>, vector<1x8x8xf32>
    %195 = vector.shape_cast %194 : vector<1x8x8xf32> to vector<8x8xf32>
    %c0_177 = arith.constant 0 : index
    %c0_178 = arith.constant 0 : index
    %196 = vector.load %arg9[%c0_177, %c0_178] : memref<8x342xf32, #tpu.memory_space<vmem>>, vector<8x288xf32>
    %cst_179 = arith.constant dense<0.000000e+00> : vector<8x288xf32>
    %197 = tpu.matmul %195, %196, %cst_179 {dimension_numbers = #tpu.dot_dimension_numbers<[1], [0], [0], [1], [0, 0, 1, 1], [], []>} : vector<8x8xf32>, vector<8x288xf32>, vector<8x288xf32> -> vector<8x288xf32>
    %c19_180 = arith.constant 19 : index
    %c0_181 = arith.constant 0 : index
    %c0_182 = arith.constant 0 : index
    %198 = vector.load %arg4[%c19_180, %c0_181, %c0_182] : memref<27x8x8xf32, #tpu.memory_space<vmem>>, vector<1x8x8xf32>
    %199 = vector.shape_cast %198 : vector<1x8x8xf32> to vector<8x8xf32>
    %c0_183 = arith.constant 0 : index
    %c1_184 = arith.constant 1 : index
    %200 = vector.load %arg9[%c0_183, %c1_184] : memref<8x342xf32, #tpu.memory_space<vmem>>, vector<8x288xf32>
    %cst_185 = arith.constant dense<0.000000e+00> : vector<8x288xf32>
    %201 = tpu.matmul %199, %200, %cst_185 {dimension_numbers = #tpu.dot_dimension_numbers<[1], [0], [0], [1], [0, 0, 1, 1], [], []>} : vector<8x8xf32>, vector<8x288xf32>, vector<8x288xf32> -> vector<8x288xf32>
    %202 = arith.addf %197, %201 : vector<8x288xf32>
    %c20_186 = arith.constant 20 : index
    %c0_187 = arith.constant 0 : index
    %c0_188 = arith.constant 0 : index
    %203 = vector.load %arg4[%c20_186, %c0_187, %c0_188] : memref<27x8x8xf32, #tpu.memory_space<vmem>>, vector<1x8x8xf32>
    %204 = vector.shape_cast %203 : vector<1x8x8xf32> to vector<8x8xf32>
    %c0_189 = arith.constant 0 : index
    %c2_190 = arith.constant 2 : index
    %205 = vector.load %arg9[%c0_189, %c2_190] : memref<8x342xf32, #tpu.memory_space<vmem>>, vector<8x288xf32>
    %cst_191 = arith.constant dense<0.000000e+00> : vector<8x288xf32>
    %206 = tpu.matmul %204, %205, %cst_191 {dimension_numbers = #tpu.dot_dimension_numbers<[1], [0], [0], [1], [0, 0, 1, 1], [], []>} : vector<8x8xf32>, vector<8x288xf32>, vector<8x288xf32> -> vector<8x288xf32>
    %207 = arith.addf %202, %206 : vector<8x288xf32>
    %c21 = arith.constant 21 : index
    %c0_192 = arith.constant 0 : index
    %c0_193 = arith.constant 0 : index
    %208 = vector.load %arg4[%c21, %c0_192, %c0_193] : memref<27x8x8xf32, #tpu.memory_space<vmem>>, vector<1x8x8xf32>
    %209 = vector.shape_cast %208 : vector<1x8x8xf32> to vector<8x8xf32>
    %c0_194 = arith.constant 0 : index
    %c18_195 = arith.constant 18 : index
    %210 = vector.load %arg9[%c0_194, %c18_195] : memref<8x342xf32, #tpu.memory_space<vmem>>, vector<8x288xf32>
    %cst_196 = arith.constant dense<0.000000e+00> : vector<8x288xf32>
    %211 = tpu.matmul %209, %210, %cst_196 {dimension_numbers = #tpu.dot_dimension_numbers<[1], [0], [0], [1], [0, 0, 1, 1], [], []>} : vector<8x8xf32>, vector<8x288xf32>, vector<8x288xf32> -> vector<8x288xf32>
    %212 = arith.addf %207, %211 : vector<8x288xf32>
    %c22 = arith.constant 22 : index
    %c0_197 = arith.constant 0 : index
    %c0_198 = arith.constant 0 : index
    %213 = vector.load %arg4[%c22, %c0_197, %c0_198] : memref<27x8x8xf32, #tpu.memory_space<vmem>>, vector<1x8x8xf32>
    %214 = vector.shape_cast %213 : vector<1x8x8xf32> to vector<8x8xf32>
    %c0_199 = arith.constant 0 : index
    %c19_200 = arith.constant 19 : index
    %215 = vector.load %arg9[%c0_199, %c19_200] : memref<8x342xf32, #tpu.memory_space<vmem>>, vector<8x288xf32>
    %cst_201 = arith.constant dense<0.000000e+00> : vector<8x288xf32>
    %216 = tpu.matmul %214, %215, %cst_201 {dimension_numbers = #tpu.dot_dimension_numbers<[1], [0], [0], [1], [0, 0, 1, 1], [], []>} : vector<8x8xf32>, vector<8x288xf32>, vector<8x288xf32> -> vector<8x288xf32>
    %217 = arith.addf %212, %216 : vector<8x288xf32>
    %c23 = arith.constant 23 : index
    %c0_202 = arith.constant 0 : index
    %c0_203 = arith.constant 0 : index
    %218 = vector.load %arg4[%c23, %c0_202, %c0_203] : memref<27x8x8xf32, #tpu.memory_space<vmem>>, vector<1x8x8xf32>
    %219 = vector.shape_cast %218 : vector<1x8x8xf32> to vector<8x8xf32>
    %c0_204 = arith.constant 0 : index
    %c20_205 = arith.constant 20 : index
    %220 = vector.load %arg9[%c0_204, %c20_205] : memref<8x342xf32, #tpu.memory_space<vmem>>, vector<8x288xf32>
    %cst_206 = arith.constant dense<0.000000e+00> : vector<8x288xf32>
    %221 = tpu.matmul %219, %220, %cst_206 {dimension_numbers = #tpu.dot_dimension_numbers<[1], [0], [0], [1], [0, 0, 1, 1], [], []>} : vector<8x8xf32>, vector<8x288xf32>, vector<8x288xf32> -> vector<8x288xf32>
    %222 = arith.addf %217, %221 : vector<8x288xf32>
    %c24 = arith.constant 24 : index
    %c0_207 = arith.constant 0 : index
    %c0_208 = arith.constant 0 : index
    %223 = vector.load %arg4[%c24, %c0_207, %c0_208] : memref<27x8x8xf32, #tpu.memory_space<vmem>>, vector<1x8x8xf32>
    %224 = vector.shape_cast %223 : vector<1x8x8xf32> to vector<8x8xf32>
    %c0_209 = arith.constant 0 : index
    %c36_210 = arith.constant 36 : index
    %225 = vector.load %arg9[%c0_209, %c36_210] : memref<8x342xf32, #tpu.memory_space<vmem>>, vector<8x288xf32>
    %cst_211 = arith.constant dense<0.000000e+00> : vector<8x288xf32>
    %226 = tpu.matmul %224, %225, %cst_211 {dimension_numbers = #tpu.dot_dimension_numbers<[1], [0], [0], [1], [0, 0, 1, 1], [], []>} : vector<8x8xf32>, vector<8x288xf32>, vector<8x288xf32> -> vector<8x288xf32>
    %227 = arith.addf %222, %226 : vector<8x288xf32>
    %c25 = arith.constant 25 : index
    %c0_212 = arith.constant 0 : index
    %c0_213 = arith.constant 0 : index
    %228 = vector.load %arg4[%c25, %c0_212, %c0_213] : memref<27x8x8xf32, #tpu.memory_space<vmem>>, vector<1x8x8xf32>
    %229 = vector.shape_cast %228 : vector<1x8x8xf32> to vector<8x8xf32>
    %c0_214 = arith.constant 0 : index
    %c37_215 = arith.constant 37 : index
    %230 = vector.load %arg9[%c0_214, %c37_215] : memref<8x342xf32, #tpu.memory_space<vmem>>, vector<8x288xf32>
    %cst_216 = arith.constant dense<0.000000e+00> : vector<8x288xf32>
    %231 = tpu.matmul %229, %230, %cst_216 {dimension_numbers = #tpu.dot_dimension_numbers<[1], [0], [0], [1], [0, 0, 1, 1], [], []>} : vector<8x8xf32>, vector<8x288xf32>, vector<8x288xf32> -> vector<8x288xf32>
    %232 = arith.addf %227, %231 : vector<8x288xf32>
    %c26 = arith.constant 26 : index
    %c0_217 = arith.constant 0 : index
    %c0_218 = arith.constant 0 : index
    %233 = vector.load %arg4[%c26, %c0_217, %c0_218] : memref<27x8x8xf32, #tpu.memory_space<vmem>>, vector<1x8x8xf32>
    %234 = vector.shape_cast %233 : vector<1x8x8xf32> to vector<8x8xf32>
    %c0_219 = arith.constant 0 : index
    %c38_220 = arith.constant 38 : index
    %235 = vector.load %arg9[%c0_219, %c38_220] : memref<8x342xf32, #tpu.memory_space<vmem>>, vector<8x288xf32>
    %cst_221 = arith.constant dense<0.000000e+00> : vector<8x288xf32>
    %236 = tpu.matmul %234, %235, %cst_221 {dimension_numbers = #tpu.dot_dimension_numbers<[1], [0], [0], [1], [0, 0, 1, 1], [], []>} : vector<8x8xf32>, vector<8x288xf32>, vector<8x288xf32> -> vector<8x288xf32>
    %237 = arith.addf %232, %236 : vector<8x288xf32>
    %238 = vector.broadcast %193 : vector<8x1xf32> to vector<8x288xf32>
    %239 = arith.addf %237, %238 : vector<8x288xf32>
    %c0_222 = arith.constant 0 : index
    %c0_223 = arith.constant 0 : index
    %240 = vector.load %arg6[%c0_222, %c0_223] : memref<8x4xf32, #tpu.memory_space<vmem>>, vector<8x4xf32>
    %c0_224 = arith.constant 0 : index
    %c0_225 = arith.constant 0 : index
    %c0_226 = arith.constant 0 : index
    %241 = vector.load %arg1[%c0_224, %c0_225, %c0_226] : memref<1x4x288xf32, #tpu.memory_space<vmem>>, vector<1x4x288xf32>
    %242 = vector.shape_cast %241 : vector<1x4x288xf32> to vector<4x288xf32>
    %cst_227 = arith.constant dense<0.000000e+00> : vector<8x288xf32>
    %243 = tpu.matmul %240, %242, %cst_227 {dimension_numbers = #tpu.dot_dimension_numbers<[1], [0], [0], [1], [0, 0, 1, 1], [], []>} : vector<8x4xf32>, vector<4x288xf32>, vector<8x288xf32> -> vector<8x288xf32>
    %c0_228 = arith.constant 0 : index
    %c0_229 = arith.constant 0 : index
    %244 = vector.load %arg7[%c0_228, %c0_229] : memref<8x1xf32, #tpu.memory_space<vmem>>, vector<8x1xf32>
    %245 = vector.broadcast %244 : vector<8x1xf32> to vector<8x288xf32>
    %246 = arith.addf %243, %245 : vector<8x288xf32>
    %247 = arith.addf %246, %239 : vector<8x288xf32>
    %c0_230 = arith.constant 0 : index
    %c0_231 = arith.constant 0 : index
    %c0_232 = arith.constant 0 : index
    %248 = vector.load %arg8[%c0_230, %c0_231, %c0_232] : memref<1x8x288xf32, #tpu.memory_space<vmem>>, vector<1x8x288xf32>
    %249 = vector.shape_cast %248 : vector<1x8x288xf32> to vector<8x288xf32>
    %250 = vector.shape_cast %247 : vector<8x288xf32> to vector<1x8x288xf32>
    tpu.vector_store %arg8[%c0_230, %c0_231, %c0_232], %250 {strides = array<i32>} : memref<1x8x288xf32, #tpu.memory_space<vmem>>, vector<1x8x288xf32>,
    return
  }
  func.func @transform_0(%arg0: i32) -> (i32, i32, i32) {
    %c0_i32 = arith.constant 0 : i32
    %c0_i32_0 = arith.constant 0 : i32
    %c0_i32_1 = arith.constant 0 : i32
    return %arg0, %c0_i32, %c0_i32_0 : i32, i32, i32
  }
  func.func @transform_1(%arg0: i32) -> (i32, i32, i32) {
    %c0_i32 = arith.constant 0 : i32
    %c0_i32_0 = arith.constant 0 : i32
    %c0_i32_1 = arith.constant 0 : i32
    %c0_i32_2 = arith.constant 0 : i32
    return %c0_i32, %c0_i32_0, %c0_i32_1 : i32, i32, i32
  }
  func.func @transform_2(%arg0: i32) -> (i32, i32) {
    %c0_i32 = arith.constant 0 : i32
    %c0_i32_0 = arith.constant 0 : i32
    %c0_i32_1 = arith.constant 0 : i32
    return %c0_i32, %c0_i32_0 : i32, i32
  }
  func.func @transform_3(%arg0: i32) -> (i32, i32, i32) {
    %c0_i32 = arith.constant 0 : i32
    %c0_i32_0 = arith.constant 0 : i32
    %c0_i32_1 = arith.constant 0 : i32
    %c0_i32_2 = arith.constant 0 : i32
    return %c0_i32, %c0_i32_0, %c0_i32_1 : i32, i32, i32
  }
  func.func @transform_4(%arg0: i32) -> (i32, i32, i32) {
    %c0_i32 = arith.constant 0 : i32
    %c0_i32_0 = arith.constant 0 : i32
    %c0_i32_1 = arith.constant 0 : i32
    %c0_i32_2 = arith.constant 0 : i32
    return %c0_i32, %c0_i32_0, %c0_i32_1 : i32, i32, i32
  }
  func.func @transform_5(%arg0: i32) -> (i32, i32) {
    %c0_i32 = arith.constant 0 : i32
    %c0_i32_0 = arith.constant 0 : i32
    %c0_i32_1 = arith.constant 0 : i32
    return %c0_i32, %c0_i32_0 : i32, i32
  }
  func.func @transform_6(%arg0: i32) -> (i32, i32) {
    %c0_i32 = arith.constant 0 : i32
    %c0_i32_0 = arith.constant 0 : i32
    %c0_i32_1 = arith.constant 0 : i32
    return %c0_i32, %c0_i32_0 : i32, i32
  }
  func.func @transform_7(%arg0: i32) -> (i32, i32, i32) {
    %c0_i32 = arith.constant 0 : i32
    %c0_i32_0 = arith.constant 0 : i32
    %c0_i32_1 = arith.constant 0 : i32
    return %arg0, %c0_i32, %c0_i32_0 : i32, i32, i32
  }
}

</mosaic_0001>

<bundles_post_ra>
// kernel: tpu_custom_call.1
= control target key start
LH: loop header
LB: loop body
LE: loop exit
PB: predicated region body
PF: predicated region fallthrough
CT: control target
= control target key end

     0   :  { %12 = vsyncpa [#allocation4], 0  ;;  %s7822_s0 = inlined_call_operand.vmem [shape: f32[2,4,288], index: 0, kind: input, shape index: {}]   ;;  %s7823_s1 = inlined_call_operand.vmem [shape: f32[9,8,4], index: 1, kind: input, shape index: {}]   ;;  %s7824_s2 = inlined_call_operand.vmem [shape: f32[8,1], index: 2, kind: input, shape index: {}]   ;;  %s7825_s3 = inlined_call_operand.vmem [shape: f32[27,8,8], index: 3, kind: input, shape index: {}]   ;;  %s7826_s4 = inlined_call_operand.vmem [shape: f32[3,8,1], index: 4, kind: input, shape index: {}]   ;;  %s7827_s5 = inlined_call_operand.vmem [shape: f32[8,4], index: 5, kind: input, shape index: {}]   ;;  %s7828_s6 = inlined_call_operand.vmem [shape: f32[8,1], index: 6, kind: input, shape index: {}]   ;;  %s7829_s7 = inlined_call_operand.hbm [shape: f32[2,8,288], index: 7, kind: output, shape index: {}]  }
   0x1   :  { %14 = vsyncpa [#allocation4 + $0x1], 0  ;;  %s7057_s24 = smov 0   ;;  %s7059_s25 = smov 0  }
   0x2   :  { %s7061_s26 = smov 0   ;;  %s7063_s27 = smov 0  }
   0x3 LB: > { %s7078_s28 = sadd.s32 4294967295, %s7002_s27   ;;  %s6472_s29 = sadd.s32 4294967294, %s7002_s27   ;;  %s7002_s27 = sphi %s7063_s27, %s7864_s27   ;;  %s6998_s26 = sphi %s7061_s26, %s7863_s26   ;;  %s6994_s25 = sphi %s7059_s25, %s7862_s25   ;;  %s6990_s24 = sphi %s7057_s24, %s7861_s24  }
   0x4   : > { %s7082_s30 = sadd.s32 1, %s7002_s27   ;;  %s179_s8 = sadd.s32 1, %s6998_s26 }
   0x5   : > { %s176_s9 = ssub.s32 %s7002_s27, %s7082_s30  ;;  %p189_p0 = scmp.ne.s32.totalorder %s6998_s26, %s6994_s25 }
   0x6   : > { %p177_p1 = scmp.eq.s32.totalorder %s176_s9, 0  ;;  %p190_p2 = scmp.eq.s32.totalorder %s7078_s28, 1 }
   0x7   : > { %p195_p3 = scmp.ne.s32.totalorder %s6994_s25, %s6990_s24  ;;  %p196_p4 = scmp.eq.s32.totalorder %s6472_s29, 1 }
   0x8   : > { %s7093_s10 = scalar_select %p177_p1, %s6998_s26, %s179_s8  }
   0x9   : > { %p7095_p5 = por %p190_p2, %p189_p0  ;;  %p7099_p6 = por %p196_p4, %p195_p3 }
   0xa   : > { %p6475_p7 = scmp.ge.s32.totalorder %s7002_s27, 1  ;;  %p240_p8 = scmp.lt.s32.totalorder %s7002_s27, 3 }
   0xc   : > { %p241_p9 = pnand %p6475_p7, %p240_p8 }
   0xd   : > { %p272_p10 = scmp.lt.s32.totalorder (!%p241_p9), %s7078_s28, 1  ;;  %s7005_s18 = smov (!%p241_p9), 19  }
   0xe   : > { %244 = sbr.rel (%p241_p9) target bundleno = 1983 (0x7bf), region = 48  ;;  %s7007_s19 = smov (!%p241_p9), 127  }
   0xf   : > { %s7008_s20 = smov (!%p241_p9), 126   ;;  %s7009_s21 = smov (!%p241_p9), 110  }
  0x10   : > { %s7010_s22 = smov (!%p241_p9), 109   ;;  %s7011_s23 = smov (!%p241_p9), 108  }
  0x11   : > { %s7012_s29 = smov (!%p241_p9), 92   ;;  %s7013_s8 = smov (!%p241_p9), 91  }
  0x12   : > { %s7015_s9 = smov (!%p241_p9), 90   ;;  %s6887_s16 = smul.u32 (!%p241_p9), 384, %s7078_s28 }
  0x13   : > { %vm277_vm0 = vcmask 154624   ;;  %v7004_v0 = vmov 0.0   ;;  %s273_s13 = scalar_select %p272_p10, %s7078_s28, 1  ;;  %vm279_vm1 = vcmask 703896   ;;  %vm299_vm2 = vcmask 1043608   ;;  %v304_v15 = vld [vmem:[%s7824_s2] sm:$0xff] }
  0x14   : > { %278 = vst.msk [vmem:[#allocation2] sm:$0xff] %vm277_vm0, %v7004_v0  ;;  %6694 = vmatprep.subr.mxu1 %v7004_v0  ;;  %398 = vmatprep.mubr.f32.mxu0 %v7004_v0  ;;  %vm302_vm3 = vcmask 412672   ;;  %vm7006_vm4 = vmmov 0   ;;  %v7014_v14 = vmov 0   ;;  %vm7831_vm5 = vcmask 1043456   ;;  %v6477_v20 = vld [vmem:[%s7823_s1 + $0x8] sm:$0xff] }
  0x15   : > { %280 = vst.msk [vmem:[#allocation2 + $0x10] sm:$0xff] %vm279_vm1, %v7004_v0  ;;  %s6880_s14 = smul.u32 12, %s273_s13  ;;  %6696 = vmatprep.mubr.msk.f32.mxu1 %vm7006_vm4, %v7004_v0  ;;  %6939 = vset.pattern.permute.xlu1 %v7014_v14  ;;  %vm7830_vm6 = vcmask 31744   ;;  %vm320_vm7 = vcmask 1039360   ;;  %v305_v23 = vld [vmem:[%s7823_s1] sm:$0xff]  ;;  %vm633_vm8 = vcmask 1031168  }
  0x16   : > { %6940 = vset.pattern.permute.xlu0 %v7014_v14  ;;  %v6488_v30 = vld [vmem:[%s7823_s1 + $0x10] sm:$0xff]  ;;  %vm797_vm9 = vcmask 900096   ;;  %v6494_v35 = vld [vmem:[%s7823_s1 + $0x18] sm:$0xff]  ;;  %vm961_vm10 = vcmask 891904   ;;  %v6500_v40 = vld [vmem:[%s7823_s1 + $0x20] sm:$0xff]  ;;  %vm1125_vm11 = vcmask 883712  }
  0x17   : > { %s7115_s17 = scalar_lea.vmem %s7822_s0, %s6880_s14  ;;  %v6506_v45 = vld [vmem:[%s7823_s1 + $0x28] sm:$0xff]  ;;  %vm1289_vm12 = vcmask 752640   ;;  %v6512_v50 = vld [vmem:[%s7823_s1 + $0x30] sm:$0xff]  ;;  %vm7833_vm13 = vcmask 744448   ;;  %v6518_v55 = vld [vmem:[%s7823_s1 + $0x38] sm:$0xff]  ;;  %vm7832_vm14 = vcmask 736256  }
  0x18   : > { %v281_v1 = vld [vmem:[%s7115_s17] sm:$0xff]  ;;  %v282_v2 = vld [vmem:[%s7115_s17 + $0x8] sm:$0xf]  ;;  %s7016_s28 = smov [#allocation3]  }
  0x19   : > { %v283_v3 = vmax.f32 %v281_v1, 0.0  ;;  %v284_v4 = vmax.f32 %v282_v2, 0.0  ;;  %v6524_v60 = vld [vmem:[%s7823_s1 + $0x40] sm:$0xff] }
  0x1b   : > { %288 = vrot.lane.b32.xlu0 %v283_v3, %s7005_s18  ;;  %v287_v5 = vcombine.high %v283_v3, %v283_v3  ;;  %292 = vrot.lane.b32.xlu1 %v284_v4, %s7005_s18 }
  0x1f   : > { %290 = vrot.lane.b32.xlu0 %v287_v5, %s7005_s18  ;;  %v1781_v5 = vlaneseq }
  0x8d   : > { %v289_v6 = vpop.permute.xlu0 %288  ;;  %v293_v7 = vpop.permute.xlu1 %292 }
  0x8e   : > { %300 = vst.msk [vmem:[#allocation2] sm:$0xf] %vm299_vm2, %v289_v6 }
  0x91   : > { %v291_v8 = vpop.permute.xlu0 %290 }
  0x92   : > { %v294_v9 = vsel %vm277_vm0, %v289_v6, %v291_v8  ;;  %v295_v10 = vsel %vm277_vm0, %v291_v8, %v293_v7 }
  0x93   : > { %301 = vst [vmem:[#allocation2 + $0x8] sm:$0xf] %v294_v9  ;;  %303 = vst.msk [vmem:[#allocation2 + $0x10] sm:$0xf] %vm302_vm3, %v295_v10  ;;  %v1782_v9 = vand.u32 127, %v1781_v5 }
  0x95   : > { %v7126_v11 = vld [vmem:[#allocation2] sm:$0xf] }
  0x96   : > { %314 = vrot.lane.b32.xlu1 %v7126_v11, %s7007_s19  ;;  %627 = vrot.lane.b32.xlu0 %v7126_v11, %s7008_s20 }
  0x9a   : > { %791 = vrot.lane.b32.xlu1 %v7126_v11, %s7009_s21  ;;  %955 = vrot.lane.b32.xlu0 %v7126_v11, %s7010_s22  ;;  %v308_v12 = vld [vmem:[#allocation2 + $0x10] sm:$0xf]  ;;  %v307_v13 = vld [vmem:[#allocation2 + $0x8] sm:$0xf] }
  0x9e   : > { %1119 = vrot.lane.b32.xlu1 %v7126_v11, %s7011_s23  ;;  %318 = vrot.lane.b32.xlu0 %v308_v12, %s7007_s19 }
  0xa2   : > { %1283 = vrot.lane.b32.xlu0 %v7126_v11, %s7012_s29  ;;  %316 = vrot.lane.b32.xlu1 %v307_v13, %s7007_s19 }
  0xa6   : > { %629 = vrot.lane.b32.xlu0 %v307_v13, %s7008_s20  ;;  %1447 = vrot.lane.b32.xlu1 %v7126_v11, %s7013_s8 }
  0xaa   : > { %795 = vrot.lane.b32.xlu0 %v308_v12, %s7009_s21  ;;  %631 = vrot.lane.b32.xlu1 %v308_v12, %s7008_s20 }
  0xae   : > { %957 = vrot.lane.b32.xlu0 %v307_v13, %s7010_s22  ;;  %793 = vrot.lane.b32.xlu1 %v307_v13, %s7009_s21 }
  0xb2   : > { %1123 = vrot.lane.b32.xlu0 %v308_v12, %s7011_s23  ;;  %959 = vrot.lane.b32.xlu1 %v308_v12, %s7010_s22 }
  0xb6   : > { %1285 = vrot.lane.b32.xlu0 %v307_v13, %s7012_s29  ;;  %1121 = vrot.lane.b32.xlu1 %v307_v13, %s7011_s23 }
  0xba   : > { %1451 = vrot.lane.b32.xlu0 %v308_v12, %s7013_s8  ;;  %1287 = vrot.lane.b32.xlu1 %v308_v12, %s7012_s29 }
  0xbe   : > { %1613 = vrot.lane.b32.xlu0 %v307_v13, %s7015_s9  ;;  %1449 = vrot.lane.b32.xlu1 %v307_v13, %s7013_s8 }
  0xc2   : > { %1611 = vrot.lane.b32.xlu0 %v7126_v11, %s7015_s9  ;;  %1615 = vrot.lane.b32.xlu1 %v308_v12, %s7015_s9 }
  0xc6   : > { %1775 = vperm.xlu1 %6939, %v304_v15   ;;  %v7300_v14 = vmul.u32.u64.low 3817748708, %v1782_v9  ;;  %v7301_v15 = vmul.u32.u64.high 3817748708, %v1782_v9, %v7300_v14 }
 0x108   : > { %v315_v16 = vpop.permute.xlu1 %314  ;;  %v628_v17 = vpop.permute.xlu0 %627 }
 0x10c   : > { %v792_v18 = vpop.permute.xlu1 %791  ;;  %v7163_v19 = vpop.permute.xlu0 %955 }
 0x110   : > { %v7168_v21 = vpop.permute.xlu1 %1119  ;;  %v319_v22 = vpop.permute.xlu0 %318 }
 0x111   : > { %6695 = vmatpush3.msk.msra.mxu1 %vm7831_vm5, %v319_v22 }
 0x112   : > { %6699 = vmatprep.subr.mxu1 %v7004_v0  ;;  %6697 = vmatmul.mubr.msk.f32.vlgmr.msra.gmra.mxu1 %vm7830_vm6, %v6477_v20 }
 0x113   : > { %6700 = vmatpush3.msk.msra.mxu1 %vm7831_vm5, %v308_v12  ;;  %6701 = vmatprep.mubr.msk.f32.mxu1 %vm7006_vm4, %v7004_v0 }
 0x114   : > { %v317_v24 = vpop.permute.xlu1 %316  ;;  %v7179_v25 = vpop.permute.xlu0 %1283  ;;  %6704 = vmatprep.subr.mxu1 %v7004_v0 }
 0x115   : > { %v322_v26 = vsel %vm320_vm7, %v317_v24, %v319_v22  ;;  %v321_v27 = vsel %vm320_vm7, %v315_v16, %v317_v24  ;;  %v1784_v16 = vadd.s32 256, %v1782_v9 }
 0x116   : > { %6478 = vmatprep.subr.msk.mxu0 %vm7831_vm5, %v322_v26  ;;  %6702 = vmatmul.mubr.msk.f32.vlgmr.msra.gmra.mxu1 %vm7830_vm6, %v305_v23 }
 0x117   : > { %6479 = vmatpush1.msk.msra.mxu0 %vm7831_vm5, %v321_v27  ;;  %6706 = vmatprep.mubr.msk.f32.mxu1 %vm7006_vm4, %v7004_v0 }
 0x118   : > { %v7189_v28 = vpop.permute.xlu1 %1447  ;;  %6480 = vmatmul.mubr.msk.f32.vlgmr.msra.gmra.mxu0 %vm7830_vm6, %v6477_v20  ;;  %6483 = vmatprep.subr.msk.mxu0 %vm7831_vm5, %v307_v13  ;;  %v630_v29 = vpop.permute.xlu0 %629 }
 0x119   : > { %6484 = vmatpush1.msk.msra.mxu0 %vm7831_vm5, %v7126_v11  ;;  %548 = vmatprep.mubr.f32.mxu0 %v7004_v0  ;;  %v634_v34 = vsel %vm633_vm8, %v628_v17, %v630_v29  ;;  %v1783_v11 = vadd.s32 128, %v1782_v9 }
 0x11c   : > { %v632_v31 = vpop.permute.xlu1 %631  ;;  %6485 = vmatmul.mubr.msk.f32.vlgmr.msra.gmra.mxu0 %vm7830_vm6, %v305_v23  ;;  %v796_v32 = vpop.permute.xlu0 %795  ;;  %v7306_v23 = vmul.u32.u64.low 3817748708, %v1784_v16  ;;  %v7307_v24 = vmul.u32.u64.high 3817748708, %v1784_v16, %v7306_v23 }
 0x11d   : > { %6705 = vmatpush3.msk.msra.mxu1 %vm7831_vm5, %v632_v31  ;;  %v635_v33 = vsel %vm633_vm8, %v630_v29, %v632_v31  ;;  %709 = vmatprep.mubr.f32.mxu0 %v7004_v0 }
 0x11e   : > { %6489 = vmatprep.subr.msk.mxu0 %vm7831_vm5, %v635_v33  ;;  %6707 = vmatmul.mubr.msk.f32.vlgmr.msra.gmra.mxu1 %vm7830_vm6, %v6488_v30 }
 0x11f   : > { %6709 = vmatprep.subr.mxu1 %v7004_v0  ;;  %6490 = vmatpush1.msk.msra.mxu0 %vm7831_vm5, %v634_v34 }
 0x120   : > { %6710 = vmatpush3.msk.msra.mxu1 %vm7831_vm5, %v796_v32  ;;  %v794_v36 = vpop.permute.xlu1 %793  ;;  %6491 = vmatmul.mubr.msk.f32.vlgmr.msra.gmra.mxu0 %vm7830_vm6, %v6488_v30  ;;  %v958_v37 = vpop.permute.xlu0 %957  ;;  %v1791_v30 = vshrl.u32 %v7301_v15, 4 }
 0x121   : > { %v798_v38 = vsel %vm797_vm9, %v792_v18, %v794_v36  ;;  %v799_v39 = vsel %vm797_vm9, %v794_v36, %v796_v32  ;;  %6711 = vmatprep.mubr.msk.f32.mxu1 %vm7006_vm4, %v7004_v0  ;;  %873 = vmatprep.mubr.f32.mxu0 %v7004_v0  ;;  %v962_v44 = vsel %vm961_vm10, %v7163_v19, %v958_v37 }
 0x122   : > { %6495 = vmatprep.subr.msk.mxu0 %vm7831_vm5, %v799_v39  ;;  %6712 = vmatmul.mubr.msk.f32.vlgmr.msra.gmra.mxu1 %vm7830_vm6, %v6494_v35  ;;  %v7303_v19 = vmul.u32.u64.low 3817748708, %v1783_v11  ;;  %v7304_v20 = vmul.u32.u64.high 3817748708, %v1783_v11, %v7303_v19 }
 0x123   : > { %6496 = vmatpush1.msk.msra.mxu0 %vm7831_vm5, %v798_v38  ;;  %6714 = vmatprep.subr.mxu1 %v7004_v0  ;;  %v1813_v38 = vshrl.u32 %v7307_v24, 4 }
 0x124   : > { %v960_v41 = vpop.permute.xlu1 %959  ;;  %6497 = vmatmul.mubr.msk.f32.vlgmr.msra.gmra.mxu0 %vm7830_vm6, %v6494_v35  ;;  %v1124_v42 = vpop.permute.xlu0 %1123  ;;  %6716 = vmatprep.mubr.msk.f32.mxu1 %vm7006_vm4, %v7004_v0  ;;  %v1802_v34 = vshrl.u32 %v7304_v20, 4 }
 0x125   : > { %v963_v43 = vsel %vm961_vm10, %v958_v37, %v960_v41  ;;  %6715 = vmatpush3.msk.msra.mxu1 %vm7831_vm5, %v960_v41  ;;  %1037 = vmatprep.mubr.f32.mxu0 %v7004_v0  ;;  %v1792_v37 = vmul.u32 18, %v1791_v30 }
 0x126   : > { %6501 = vmatprep.subr.msk.mxu0 %vm7831_vm5, %v963_v43  ;;  %6717 = vmatmul.mubr.msk.f32.vlgmr.msra.gmra.mxu1 %vm7830_vm6, %v6500_v40  ;;  %v1803_v43 = vmul.u32 18, %v1802_v34 }
 0x127   : > { %6719 = vmatprep.subr.mxu1 %v7004_v0  ;;  %6502 = vmatpush1.msk.msra.mxu0 %vm7831_vm5, %v962_v44 }
 0x128   : > { %6720 = vmatpush3.msk.msra.mxu1 %vm7831_vm5, %v1124_v42  ;;  %v1122_v46 = vpop.permute.xlu1 %1121  ;;  %6503 = vmatmul.mubr.msk.f32.vlgmr.msra.gmra.mxu0 %vm7830_vm6, %v6500_v40  ;;  %v1286_v47 = vpop.permute.xlu0 %1285 }
 0x129   : > { %v1126_v48 = vsel %vm1125_vm11, %v7168_v21, %v1122_v46  ;;  %v1127_v49 = vsel %vm1125_vm11, %v1122_v46, %v1124_v42  ;;  %6721 = vmatprep.mubr.msk.f32.mxu1 %vm7006_vm4, %v7004_v0  ;;  %1201 = vmatprep.mubr.f32.mxu0 %v7004_v0  ;;  %v1290_v54 = vsel %vm1289_vm12, %v7179_v25, %v1286_v47 }
 0x12a   : > { %6507 = vmatprep.subr.msk.mxu0 %vm7831_vm5, %v1127_v49  ;;  %6722 = vmatmul.mubr.msk.f32.vlgmr.msra.gmra.mxu1 %vm7830_vm6, %v6506_v45  ;;  %v1814_v49 = vmul.u32 18, %v1813_v38 }
 0x12b   : > { %6508 = vmatpush1.msk.msra.mxu0 %vm7831_vm5, %v1126_v48  ;;  %6724 = vmatprep.subr.mxu1 %v7004_v0  ;;  %v1793_v48 = vsub.s32 %v1782_v9, %v1792_v37 }
 0x12c   : > { %v1288_v51 = vpop.permute.xlu1 %1287  ;;  %6509 = vmatmul.mubr.msk.f32.vlgmr.msra.gmra.mxu0 %vm7830_vm6, %v6506_v45  ;;  %v1452_v52 = vpop.permute.xlu0 %1451  ;;  %6726 = vmatprep.mubr.msk.f32.mxu1 %vm7006_vm4, %v7004_v0 }
 0x12d   : > { %v1291_v53 = vsel %vm1289_vm12, %v1286_v47, %v1288_v51  ;;  %6725 = vmatpush3.msk.msra.mxu1 %vm7831_vm5, %v1288_v51  ;;  %1365 = vmatprep.mubr.f32.mxu0 %v7004_v0  ;;  %vm1818_vm15 = vcmp.ne.s32.totalorder %v1793_v48, 0  ;;  %vm1821_vm1 = vcmp.lt.s32.totalorder %v1793_v48, 0 }
 0x12e   : > { %6513 = vmatprep.subr.msk.mxu0 %vm7831_vm5, %v1291_v53  ;;  %6727 = vmatmul.mubr.msk.f32.vlgmr.msra.gmra.mxu1 %vm7830_vm6, %v6512_v50 }
 0x12f   : > { %6729 = vmatprep.subr.mxu1 %v7004_v0  ;;  %6514 = vmatpush1.msk.msra.mxu0 %vm7831_vm5, %v1290_v54 }
 0x130   : > { %6730 = vmatpush3.msk.msra.mxu1 %vm7831_vm5, %v1452_v52  ;;  %v1450_v56 = vpop.permute.xlu1 %1449  ;;  %6515 = vmatmul.mubr.msk.f32.vlgmr.msra.gmra.mxu0 %vm7830_vm6, %v6512_v50  ;;  %v1614_v57 = vpop.permute.xlu0 %1613 }
 0x131   : > { %v1454_v58 = vsel %vm7833_vm13, %v7189_v28, %v1450_v56  ;;  %v1455_v59 = vsel %vm7833_vm13, %v1450_v56, %v1452_v52  ;;  %6731 = vmatprep.mubr.msk.f32.mxu1 %vm7006_vm4, %v7004_v0  ;;  %1529 = vmatprep.mubr.f32.mxu0 %v7004_v0 }
 0x132   : > { %6519 = vmatprep.subr.msk.mxu0 %vm7831_vm5, %v1455_v59  ;;  %6732 = vmatmul.mubr.msk.f32.vlgmr.msra.gmra.mxu1 %vm7830_vm6, %v6518_v55 }
 0x133   : > { %6520 = vmatpush1.msk.msra.mxu0 %vm7831_vm5, %v1454_v58  ;;  %6734 = vmatprep.subr.mxu1 %v7004_v0 }
 0x134   : > { %v1616_v61 = vpop.permute.xlu1 %1615  ;;  %6521 = vmatmul.mubr.msk.f32.vlgmr.msra.gmra.mxu0 %vm7830_vm6, %v6518_v55  ;;  %v1612_v62 = vpop.permute.xlu0 %1611  ;;  %6736 = vmatprep.mubr.msk.f32.mxu1 %vm7006_vm4, %v7004_v0  ;;  %v1804_v55 = vsub.s32 %v1783_v11, %v1803_v43 }
 0x135   : > { %v1619_v63 = vsel %vm7832_vm14, %v1614_v57, %v1616_v61  ;;  %v1618_v1 = vsel %vm7832_vm14, %v1612_v62, %v1614_v57  ;;  %6735 = vmatpush3.msk.msra.mxu1 %vm7831_vm5, %v1616_v61  ;;  %1693 = vmatprep.mubr.f32.mxu0 %v7004_v0  ;;  %v1815_v61 = vsub.s32 %v1784_v16, %v1814_v49 }
 0x136   : > { %6525 = vmatprep.subr.msk.mxu0 %vm7831_vm5, %v1619_v63  ;;  %6737 = vmatmul.mubr.msk.f32.vlgmr.msra.gmra.mxu1 %vm7830_vm6, %v6524_v60  ;;  %vm1819_vm2 = vcmp.ne.s32.totalorder %v1804_v55, 0  ;;  %vm1822_vm3 = vcmp.lt.s32.totalorder %v1804_v55, 0  ;;  %v1828_v15 = vadd.s32 18, %v1804_v55 }
 0x137   : > { %6526 = vmatpush1.msk.msra.mxu0 %vm7831_vm5, %v1618_v1  ;;  %6739 = vmatprep.subr.mxu1 %v7004_v0  ;;  %vm1820_vm5 = vcmp.ne.s32.totalorder %v1815_v61, 0  ;;  %vm1823_vm14 = vcmp.lt.s32.totalorder %v1815_v61, 0  ;;  %vm1825_vm13 = vmand %vm1822_vm3, %vm1819_vm2  ;;  %vm7844_vm3 = vcmask 744448  }
 0x138   : > { %6527 = vmatmul.mubr.msk.f32.vlgmr.msra.gmra.mxu0 %vm7830_vm6, %v6524_v60  ;;  %6741 = vmatprep.mubr.msk.f32.mxu1 %vm7006_vm4, %v7004_v0  ;;  %vm7313_vm6 = vmand %vm1821_vm1, %vm1818_vm15 }
 0x139   : > { %1956 = vmatprep.mubr.f32.mxu0 %v7004_v0  ;;  %vm1826_vm15 = vmand %vm1823_vm14, %vm1820_vm5  ;;  %vm1888_vm14 = vcmask 64512  }
 0x141   : > { %v1776_v14 = vpop.permute.xlu1 %1775 }
 0x1d2   : > { %v471_v2 = vpop.f32.mrf.mxu1 }
 0x1d4   : > { %v6698_v3 = vpop.f32.mrf.mxu1 }
 0x1d6   : > { %v621_v4 = vpop.f32.mrf.mxu1 }
 0x1d7   : > { %v622_v25 = vadd.f32 %v621_v4, %v471_v2  ;;  %v1827_v4 = vadd.s32 18, %v1793_v48 }
 0x1d8   : > { %v400_v6 = vpop.f32.mrf.mxu0  ;;  %v6703_v7 = vpop.f32.mrf.mxu1 }
 0x1d9   : > { %v1830_v20 = vsel %vm7313_vm6, %v1827_v4, %v1793_v48  ;;  %vm1862_vm6 = vcmask 1047704  }
 0x1da   : > { %v402_v8 = vpop.f32.mrf.mxu0  ;;  %vm7321_vm1 = vcmp.lt.s32.totalorder %v1830_v20, 16 }
 0x1dc   : > { %v550_v10 = vpop.f32.mrf.mxu0 }
 0x1dd   : > { %v551_v39 = vadd.f32 %v550_v10, %v400_v6 }
 0x1de   : > { %v552_v12 = vpop.f32.mrf.mxu0  ;;  %v782_v13 = vpop.f32.mrf.mxu1 }
 0x1df   : > { %v788_v31 = vadd.f32 %v782_v13, %v622_v25  ;;  %v553_v44 = vadd.f32 %v552_v12, %v402_v8 }
 0x1e0   : > { %v711_v17 = vpop.f32.mrf.mxu0  ;;  %v6708_v18 = vpop.f32.mrf.mxu1 }
 0x1e1   : > { %v786_v45 = vadd.f32 %v711_v17, %v551_v39 }
 0x1e2   : > { %v713_v21 = vpop.f32.mrf.mxu0  ;;  %v946_v22 = vpop.f32.mrf.mxu1 }
 0x1e3   : > { %v952_v40 = vadd.f32 %v946_v22, %v788_v31  ;;  %v787_v50 = vadd.f32 %v713_v21, %v553_v44  ;;  %v1829_v21 = vadd.s32 18, %v1815_v61 }
 0x1e4   : > { %v875_v26 = vpop.f32.mrf.mxu0  ;;  %v6713_v27 = vpop.f32.mrf.mxu1 }
 0x1e5   : > { %v950_v51 = vadd.f32 %v875_v26, %v786_v45  ;;  %v1831_v26 = vsel %vm1825_vm13, %v1828_v15, %v1804_v55  ;;  %v1832_v30 = vsel %vm1826_vm15, %v1829_v21, %v1815_v61  ;;  %vm1865_vm13 = vcmask 416768   ;;  %v1867_v45 = vld [vmem:[%s7826_s4] sm:$0xff]  ;;  %vm7845_vm15 = vmmov %vm7844_vm3 }
 0x1e6   : > { %v877_v28 = vpop.f32.mrf.mxu0  ;;  %v1110_v29 = vpop.f32.mrf.mxu1  ;;  %vm7325_vm2 = vcmp.lt.s32.totalorder %v1831_v26, 16  ;;  %vm7332_vm5 = vcmp.lt.s32.totalorder %v1832_v30, 16 }
 0x1e7   : > { %v1116_v52 = vadd.f32 %v1110_v29, %v952_v40  ;;  %v951_v56 = vadd.f32 %v877_v28, %v787_v50  ;;  %v6530_v50 = vld [vmem:[%s7825_s3 + $0x8] sm:$0xff] }
 0x1e8   : > { %v1039_v32 = vpop.f32.mrf.mxu0  ;;  %v6718_v33 = vpop.f32.mrf.mxu1 }
 0x1e9   : > { %v1114_v57 = vadd.f32 %v1039_v32, %v950_v51 }
 0x1ea   : > { %v1041_v35 = vpop.f32.mrf.mxu0  ;;  %v1274_v36 = vpop.f32.mrf.mxu1 }
 0x1eb   : > { %v1280_v58 = vadd.f32 %v1274_v36, %v1116_v52  ;;  %v1115_v62 = vadd.f32 %v1041_v35, %v951_v56 }
 0x1ec   : > { %v1203_v41 = vpop.f32.mrf.mxu0  ;;  %v6723_v42 = vpop.f32.mrf.mxu1 }
 0x1ed   : > { %v1278_v63 = vadd.f32 %v1203_v41, %v1114_v57 }
 0x1ee   : > { %v1205_v46 = vpop.f32.mrf.mxu0  ;;  %v1438_v47 = vpop.f32.mrf.mxu1 }
 0x1ef   : > { %v1444_v1 = vadd.f32 %v1438_v47, %v1280_v58  ;;  %v1279_v5 = vadd.f32 %v1205_v46, %v1115_v62 }
 0x1f0   : > { %v1367_v53 = vpop.f32.mrf.mxu0  ;;  %v6728_v54 = vpop.f32.mrf.mxu1 }
 0x1f1   : > { %v1442_v6 = vadd.f32 %v1367_v53, %v1278_v63  ;;  %v1868_v53 = vld [vmem:[%s7825_s3] sm:$0xff] }
 0x1f2   : > { %v1369_v59 = vpop.f32.mrf.mxu0  ;;  %v1602_v60 = vpop.f32.mrf.mxu1 }
 0x1f3   : > { %v1608_v7 = vadd.f32 %v1602_v60, %v1444_v1  ;;  %v1443_v11 = vadd.f32 %v1369_v59, %v1279_v5  ;;  %v6535_v60 = vld [vmem:[%s7825_s3 + $0x10] sm:$0xff] }
 0x1f4   : > { %v1531_v2 = vpop.f32.mrf.mxu0  ;;  %v6733_v3 = vpop.f32.mrf.mxu1 }
 0x1f5   : > { %v1606_v12 = vadd.f32 %v1531_v2, %v1442_v6  ;;  %v6538_v2 = vld [vmem:[%s7825_s3 + $0x18] sm:$0xff] }
 0x1f6   : > { %v1533_v8 = vpop.f32.mrf.mxu0  ;;  %v1766_v9 = vpop.f32.mrf.mxu1 }
 0x1f7   : > { %v1772_v13 = vadd.f32 %v1766_v9, %v1608_v7  ;;  %v1607_v18 = vadd.f32 %v1533_v8, %v1443_v11  ;;  %v6541_v7 = vld [vmem:[%s7825_s3 + $0x20] sm:$0xff] }
 0x1f8   : > { %v1695_v16 = vpop.f32.mrf.mxu0  ;;  %v6738_v17 = vpop.f32.mrf.mxu1 }
 0x1f9   : > { %v1770_v19 = vadd.f32 %v1695_v16, %v1606_v12  ;;  %v1780_v23 = vadd.f32 %v1776_v14, %v1772_v13  ;;  %v6544_v12 = vld [vmem:[%s7825_s3 + $0x28] sm:$0xff]  ;;  %v6547_v17 = vld [vmem:[%s7825_s3 + $0x30] sm:$0xff] }
 0x1fa   : > { %v1697_v22 = vpop.f32.mrf.mxu0 }
 0x1fb   : > { %v1778_v24 = vadd.f32 %v1776_v14, %v1770_v19  ;;  %v1771_v25 = vadd.f32 %v1697_v22, %v1607_v18  ;;  %v1838_v34 = vmax.f32 %v1780_v23, 0.0  ;;  %v6550_v22 = vld [vmem:[%s7825_s3 + $0x38] sm:$0xff] }
 0x1fd   : > { %v1836_v28 = vmax.f32 %v1778_v24, 0.0  ;;  %v1779_v29 = vadd.f32 %v1776_v14, %v1771_v25  ;;  %v1847_v37 = vsel %vm7332_vm5, %v1838_v34, 0.0 }
 0x1ff   : > { %v1837_v32 = vmax.f32 %v1779_v29, 0.0  ;;  %v1845_v33 = vsel %vm7321_vm1, %v1836_v28, 0.0  ;;  %v6553_v28 = vld [vmem:[%s7825_s3 + $0x40] sm:$0xff] }
 0x200   : > { %1851 = vrot.lane.b32.xlu0 %v1845_v33, %s7005_s18 }
 0x201   : > { %v1846_v36 = vsel %vm7325_vm2, %v1837_v32, 0.0 }
 0x202   : > { %1853 = vrot.lane.b32.xlu1 %v1846_v36, %s7005_s18 }
 0x204   : > { %1855 = vrot.lane.b32.xlu0 %v1847_v37, %s7005_s18 }
 0x272   : > { %v1852_v38 = vpop.permute.xlu0 %1851 }
 0x273   : > { %1863 = vst.msk [vmem:[#allocation2] sm:$0xff] %vm1862_vm6, %v1852_v38 }
 0x274   : > { %v1854_v39 = vpop.permute.xlu1 %1853 }
 0x275   : > { %v1857_v44 = vsel %vm277_vm0, %v1852_v38, %v1854_v39 }
 0x276   : > { %v1856_v40 = vpop.permute.xlu0 %1855 }
 0x277   : > { %v1858_v41 = vsel %vm277_vm0, %v1854_v39, %v1856_v40 }
 0x278   : > { %1866 = vst.msk [vmem:[#allocation2 + $0x10] sm:$0xff] %vm1865_vm13, %v1858_v41 }
 0x27a   : > { %v1869_v42 = vld [vmem:[#allocation2] sm:$0xff] }
 0x27b   : > { %2179 = vrot.lane.b32.xlu0 %v1869_v42, %s7008_s20  ;;  %1877 = vrot.lane.b32.xlu1 %v1869_v42, %s7007_s19 }
 0x27f   : > { %2499 = vrot.lane.b32.xlu0 %v1869_v42, %s7010_s22  ;;  %2339 = vrot.lane.b32.xlu1 %v1869_v42, %s7009_s21  ;;  %v1871_v43 = vld [vmem:[#allocation2 + $0x10] sm:$0xff] }
 0x283   : > { %2659 = vrot.lane.b32.xlu1 %v1869_v42, %s7011_s23  ;;  %1881 = vrot.lane.b32.xlu0 %v1871_v43, %s7007_s19 }
 0x287   : > { %2819 = vrot.lane.b32.xlu0 %v1869_v42, %s7012_s29  ;;  %1879 = vrot.lane.b32.xlu1 %v1857_v44, %s7007_s19 }
 0x28b   : > { %2181 = vrot.lane.b32.xlu0 %v1857_v44, %s7008_s20  ;;  %2979 = vrot.lane.b32.xlu1 %v1869_v42, %s7013_s8 }
 0x28f   : > { %2343 = vrot.lane.b32.xlu0 %v1871_v43, %s7009_s21  ;;  %2183 = vrot.lane.b32.xlu1 %v1871_v43, %s7008_s20 }
 0x293   : > { %2501 = vrot.lane.b32.xlu0 %v1857_v44, %s7010_s22  ;;  %2341 = vrot.lane.b32.xlu1 %v1857_v44, %s7009_s21 }
 0x297   : > { %2663 = vrot.lane.b32.xlu0 %v1871_v43, %s7011_s23  ;;  %2503 = vrot.lane.b32.xlu1 %v1871_v43, %s7010_s22 }
 0x29b   : > { %2821 = vrot.lane.b32.xlu0 %v1857_v44, %s7012_s29  ;;  %2661 = vrot.lane.b32.xlu1 %v1857_v44, %s7011_s23 }
 0x29f   : > { %2983 = vrot.lane.b32.xlu0 %v1871_v43, %s7013_s8  ;;  %2823 = vrot.lane.b32.xlu1 %v1871_v43, %s7012_s29 }
 0x2a3   : > { %3141 = vrot.lane.b32.xlu0 %v1857_v44, %s7015_s9  ;;  %2981 = vrot.lane.b32.xlu1 %v1857_v44, %s7013_s8 }
 0x2a7   : > { %3139 = vrot.lane.b32.xlu0 %v1869_v42, %s7015_s9  ;;  %3143 = vrot.lane.b32.xlu1 %v1871_v43, %s7015_s9 }
 0x2ab   : > { %3299 = vperm.xlu1 %6939, %v1867_v45  }
 0x2ed   : > { %v2180_v46 = vpop.permute.xlu0 %2179  ;;  %v1878_v47 = vpop.permute.xlu1 %1877 }
 0x2f1   : > { %v2500_v48 = vpop.permute.xlu0 %2499  ;;  %v2340_v49 = vpop.permute.xlu1 %2339 }
 0x2f5   : > { %v1882_v51 = vpop.permute.xlu0 %1881  ;;  %v7376_v52 = vpop.permute.xlu1 %2659 }
 0x2f6   : > { %6740 = vmatpush3.msra.mxu1 %v1882_v51 }
 0x2f7   : > { %6744 = vmatprep.subr.mxu1 %v7004_v0  ;;  %6742 = vmatmul.mubr.msk.f32.vlgmr.msra.gmra.mxu1 %vm1888_vm14, %v6530_v50 }
 0x2f8   : > { %6745 = vmatpush3.msra.mxu1 %v1871_v43  ;;  %6746 = vmatprep.mubr.msk.f32.mxu1 %vm7006_vm4, %v7004_v0 }
 0x2f9   : > { %v7385_v54 = vpop.permute.xlu0 %2819  ;;  %v1880_v55 = vpop.permute.xlu1 %1879  ;;  %6749 = vmatprep.subr.mxu1 %v7004_v0 }
 0x2fa   : > { %v1883_v56 = vsel %vm320_vm7, %v1878_v47, %v1880_v55  ;;  %v1884_v57 = vsel %vm320_vm7, %v1880_v55, %v1882_v51 }
 0x2fb   : > { %1922 = vmatprep.subr.mxu0 %v1884_v57  ;;  %6747 = vmatmul.mubr.msk.f32.vlgmr.msra.gmra.mxu1 %vm1888_vm14, %v1868_v53 }
 0x2fc   : > { %1923 = vmatpush1.msra.mxu0 %v1883_v56  ;;  %6751 = vmatprep.mubr.msk.f32.mxu1 %vm7006_vm4, %v7004_v0 }
 0x2fd   : > { %v2182_v58 = vpop.permute.xlu0 %2181  ;;  %6531 = vmatmul.mubr.msk.f32.vlgmr.msra.gmra.mxu0 %vm1888_vm14, %v6530_v50  ;;  %2066 = vmatprep.subr.mxu0 %v1857_v44  ;;  %v7394_v59 = vpop.permute.xlu1 %2979 }
 0x2fe   : > { %2067 = vmatpush1.msra.mxu0 %v1869_v42  ;;  %2100 = vmatprep.mubr.f32.mxu0 %v7004_v0  ;;  %v2185_v1 = vsel %vm633_vm8, %v2180_v46, %v2182_v58 }
 0x301   : > { %v2344_v61 = vpop.permute.xlu0 %2343  ;;  %6533 = vmatmul.mubr.msk.f32.vlgmr.msra.gmra.mxu0 %vm1888_vm14, %v1868_v53  ;;  %v2184_v62 = vpop.permute.xlu1 %2183 }
 0x302   : > { %6750 = vmatpush3.msra.mxu1 %v2184_v62  ;;  %v2186_v63 = vsel %vm633_vm8, %v2182_v58, %v2184_v62  ;;  %2257 = vmatprep.mubr.f32.mxu0 %v7004_v0 }
 0x303   : > { %2223 = vmatprep.subr.mxu0 %v2186_v63  ;;  %6752 = vmatmul.mubr.msk.f32.vlgmr.msra.gmra.mxu1 %vm1888_vm14, %v6535_v60 }
 0x304   : > { %6754 = vmatprep.subr.mxu1 %v7004_v0  ;;  %2224 = vmatpush1.msra.mxu0 %v2185_v1 }
 0x305   : > { %6755 = vmatpush3.msra.mxu1 %v2344_v61  ;;  %v2502_v3 = vpop.permute.xlu0 %2501  ;;  %6536 = vmatmul.mubr.msk.f32.vlgmr.msra.gmra.mxu0 %vm1888_vm14, %v6535_v60  ;;  %v2342_v4 = vpop.permute.xlu1 %2341 }
 0x306   : > { %v2345_v5 = vsel %vm797_vm9, %v2340_v49, %v2342_v4  ;;  %6756 = vmatprep.mubr.msk.f32.mxu1 %vm7006_vm4, %v7004_v0  ;;  %v2346_v6 = vsel %vm797_vm9, %v2342_v4, %v2344_v61  ;;  %2417 = vmatprep.mubr.f32.mxu0 %v7004_v0  ;;  %v2505_v11 = vsel %vm961_vm10, %v2500_v48, %v2502_v3 }
 0x307   : > { %2383 = vmatprep.subr.mxu0 %v2346_v6  ;;  %6757 = vmatmul.mubr.msk.f32.vlgmr.msra.gmra.mxu1 %vm1888_vm14, %v6538_v2 }
 0x308   : > { %2384 = vmatpush1.msra.mxu0 %v2345_v5  ;;  %6759 = vmatprep.subr.mxu1 %v7004_v0 }
 0x309   : > { %v2664_v8 = vpop.permute.xlu0 %2663  ;;  %6539 = vmatmul.mubr.msk.f32.vlgmr.msra.gmra.mxu0 %vm1888_vm14, %v6538_v2  ;;  %v2504_v9 = vpop.permute.xlu1 %2503  ;;  %6761 = vmatprep.mubr.msk.f32.mxu1 %vm7006_vm4, %v7004_v0 }
 0x30a   : > { %6760 = vmatpush3.msra.mxu1 %v2504_v9  ;;  %v2506_v10 = vsel %vm961_vm10, %v2502_v3, %v2504_v9  ;;  %2577 = vmatprep.mubr.f32.mxu0 %v7004_v0 }
 0x30b   : > { %2543 = vmatprep.subr.mxu0 %v2506_v10  ;;  %6762 = vmatmul.mubr.msk.f32.vlgmr.msra.gmra.mxu1 %vm1888_vm14, %v6541_v7 }
 0x30c   : > { %6764 = vmatprep.subr.mxu1 %v7004_v0  ;;  %2544 = vmatpush1.msra.mxu0 %v2505_v11 }
 0x30d   : > { %6765 = vmatpush3.msra.mxu1 %v2664_v8  ;;  %v2822_v13 = vpop.permute.xlu0 %2821  ;;  %6542 = vmatmul.mubr.msk.f32.vlgmr.msra.gmra.mxu0 %vm1888_vm14, %v6541_v7  ;;  %v2662_v14 = vpop.permute.xlu1 %2661 }
 0x30e   : > { %v2665_v15 = vsel %vm1125_vm11, %v7376_v52, %v2662_v14  ;;  %6766 = vmatprep.mubr.msk.f32.mxu1 %vm7006_vm4, %v7004_v0  ;;  %v2666_v16 = vsel %vm1125_vm11, %v2662_v14, %v2664_v8  ;;  %2737 = vmatprep.mubr.f32.mxu0 %v7004_v0  ;;  %v2825_v21 = vsel %vm1289_vm12, %v7385_v54, %v2822_v13 }
 0x30f   : > { %2703 = vmatprep.subr.mxu0 %v2666_v16  ;;  %6767 = vmatmul.mubr.msk.f32.vlgmr.msra.gmra.mxu1 %vm1888_vm14, %v6544_v12 }
 0x310   : > { %2704 = vmatpush1.msra.mxu0 %v2665_v15  ;;  %6769 = vmatprep.subr.mxu1 %v7004_v0 }
 0x311   : > { %v2984_v18 = vpop.permute.xlu0 %2983  ;;  %6545 = vmatmul.mubr.msk.f32.vlgmr.msra.gmra.mxu0 %vm1888_vm14, %v6544_v12  ;;  %v2824_v19 = vpop.permute.xlu1 %2823  ;;  %6771 = vmatprep.mubr.msk.f32.mxu1 %vm7006_vm4, %v7004_v0 }
 0x312   : > { %6770 = vmatpush3.msra.mxu1 %v2824_v19  ;;  %v2826_v20 = vsel %vm1289_vm12, %v2822_v13, %v2824_v19  ;;  %2897 = vmatprep.mubr.f32.mxu0 %v7004_v0 }
 0x313   : > { %2863 = vmatprep.subr.mxu0 %v2826_v20  ;;  %6772 = vmatmul.mubr.msk.f32.vlgmr.msra.gmra.mxu1 %vm1888_vm14, %v6547_v17 }
 0x314   : > { %6774 = vmatprep.subr.mxu1 %v7004_v0  ;;  %2864 = vmatpush1.msra.mxu0 %v2825_v21 }
 0x315   : > { %6775 = vmatpush3.msra.mxu1 %v2984_v18  ;;  %v3142_v23 = vpop.permute.xlu0 %3141  ;;  %6548 = vmatmul.mubr.msk.f32.vlgmr.msra.gmra.mxu0 %vm1888_vm14, %v6547_v17  ;;  %v2982_v24 = vpop.permute.xlu1 %2981 }
 0x316   : > { %v2985_v25 = vsel %vm7844_vm3, %v7394_v59, %v2982_v24  ;;  %6776 = vmatprep.mubr.msk.f32.mxu1 %vm7006_vm4, %v7004_v0  ;;  %v2986_v26 = vsel %vm7845_vm15, %v2982_v24, %v2984_v18  ;;  %3057 = vmatprep.mubr.f32.mxu0 %v7004_v0  ;;  %vm7846_vm3 = vcmask 736256  }
 0x317   : > { %3023 = vmatprep.subr.mxu0 %v2986_v26  ;;  %6777 = vmatmul.mubr.msk.f32.vlgmr.msra.gmra.mxu1 %vm1888_vm14, %v6550_v22  ;;  %vm7847_vm15 = vmmov %vm7846_vm3 }
 0x318   : > { %3024 = vmatpush1.msra.mxu0 %v2985_v25  ;;  %6779 = vmatprep.subr.mxu1 %v7004_v0 }
 0x319   : > { %v3140_v29 = vpop.permute.xlu0 %3139  ;;  %6551 = vmatmul.mubr.msk.f32.vlgmr.msra.gmra.mxu0 %vm1888_vm14, %v6550_v22  ;;  %v3144_v30 = vpop.permute.xlu1 %3143  ;;  %6781 = vmatprep.mubr.msk.f32.mxu1 %vm7006_vm4, %v7004_v0 }
 0x31a   : > { %v3145_v32 = vsel %vm7846_vm3, %v3140_v29, %v3142_v23  ;;  %6780 = vmatpush3.msra.mxu1 %v3144_v30  ;;  %v3146_v33 = vsel %vm7847_vm15, %v3142_v23, %v3144_v30  ;;  %3217 = vmatprep.mubr.f32.mxu0 %v7004_v0  ;;  %vm7848_vm3 = vcmask 744448  }
 0x31b   : > { %3183 = vmatprep.subr.mxu0 %v3146_v33  ;;  %6782 = vmatmul.mubr.msk.f32.vlgmr.msra.gmra.mxu1 %vm1888_vm14, %v6553_v28  ;;  %vm7849_vm15 = vmmov %vm7848_vm3 }
 0x31c   : > { %3184 = vmatpush1.msra.mxu0 %v3145_v32  ;;  %6784 = vmatprep.subr.mxu1 %v7004_v0 }
 0x31d   : > { %6554 = vmatmul.mubr.msk.f32.vlgmr.msra.gmra.mxu0 %vm1888_vm14, %v6553_v28  ;;  %6786 = vmatprep.mubr.msk.f32.mxu1 %vm7006_vm4, %v7004_v0 }
 0x31e   : > { %3418 = vmatprep.mubr.f32.mxu0 %v7004_v0 }
 0x326   : > { %v3300_v32 = vpop.permute.xlu1 %3299 }
 0x3b7   : > { %v2029_v34 = vpop.f32.mrf.mxu1 }
 0x3b9   : > { %v6743_v36 = vpop.f32.mrf.mxu1 }
 0x3bb   : > { %v2173_v37 = vpop.f32.mrf.mxu1 }
 0x3bc   : > { %v2174_v48 = vadd.f32 %v2173_v37, %v2029_v34 }
 0x3bd   : > { %v1958_v38 = vpop.f32.mrf.mxu0  ;;  %v6748_v39 = vpop.f32.mrf.mxu1 }
 0x3bf   : > { %v1960_v40 = vpop.f32.mrf.mxu0 }
 0x3c1   : > { %v2102_v41 = vpop.f32.mrf.mxu0 }
 0x3c2   : > { %v2103_v58 = vadd.f32 %v2102_v41, %v1958_v38 }
 0x3c3   : > { %v2104_v42 = vpop.f32.mrf.mxu0  ;;  %v2330_v43 = vpop.f32.mrf.mxu1 }
 0x3c4   : > { %v2336_v53 = vadd.f32 %v2330_v43, %v2174_v48  ;;  %v2105_v62 = vadd.f32 %v2104_v42, %v1960_v40 }
 0x3c5   : > { %v2259_v44 = vpop.f32.mrf.mxu0  ;;  %v6753_v45 = vpop.f32.mrf.mxu1 }
 0x3c6   : > { %v2334_v63 = vadd.f32 %v2259_v44, %v2103_v58 }
 0x3c7   : > { %v2261_v46 = vpop.f32.mrf.mxu0  ;;  %v2490_v47 = vpop.f32.mrf.mxu1 }
 0x3c8   : > { %v2496_v59 = vadd.f32 %v2490_v47, %v2336_v53  ;;  %v2335_v3 = vadd.f32 %v2261_v46, %v2105_v62 }
 0x3c9   : > { %v2419_v49 = vpop.f32.mrf.mxu0  ;;  %v6758_v50 = vpop.f32.mrf.mxu1 }
 0x3ca   : > { %v2494_v4 = vadd.f32 %v2419_v49, %v2334_v63 }
 0x3cb   : > { %v2421_v51 = vpop.f32.mrf.mxu0  ;;  %v2650_v52 = vpop.f32.mrf.mxu1 }
 0x3cc   : > { %v2656_v5 = vadd.f32 %v2650_v52, %v2496_v59  ;;  %v2495_v8 = vadd.f32 %v2421_v51, %v2335_v3  ;;  %v6556_v52 = vld [vmem:[%s7826_s4 + $0x8] sm:$0xff] }
 0x3cd   : > { %v2579_v54 = vpop.f32.mrf.mxu0  ;;  %v6763_v55 = vpop.f32.mrf.mxu1 }
 0x3ce   : > { %v2654_v9 = vadd.f32 %v2579_v54, %v2494_v4  ;;  %v6563_v4 = vld [vmem:[%s7825_s3 + $0x58] sm:$0xff] }
 0x3cf   : > { %v2581_v56 = vpop.f32.mrf.mxu0  ;;  %v2810_v57 = vpop.f32.mrf.mxu1 }
 0x3d0   : > { %v2816_v10 = vadd.f32 %v2810_v57, %v2656_v5  ;;  %v2655_v13 = vadd.f32 %v2581_v56, %v2495_v8  ;;  %v6558_v57 = vld [vmem:[%s7825_s3 + $0x50] sm:$0xff] }
 0x3d1   : > { %v2739_v60 = vpop.f32.mrf.mxu0  ;;  %v6768_v61 = vpop.f32.mrf.mxu1 }
 0x3d2   : > { %v2814_v14 = vadd.f32 %v2739_v60, %v2654_v9  ;;  %v6557_v60 = vld [vmem:[%s7825_s3 + $0x48] sm:$0xff]  ;;  %v6566_v9 = vld [vmem:[%s7825_s3 + $0x60] sm:$0xff] }
 0x3d3   : > { %v2741_v1 = vpop.f32.mrf.mxu0  ;;  %v2970_v2 = vpop.f32.mrf.mxu1 }
 0x3d4   : > { %v2976_v15 = vadd.f32 %v2970_v2, %v2816_v10  ;;  %v2815_v18 = vadd.f32 %v2741_v1, %v2655_v13 }
 0x3d5   : > { %v2899_v6 = vpop.f32.mrf.mxu0  ;;  %v6773_v7 = vpop.f32.mrf.mxu1 }
 0x3d6   : > { %v2974_v19 = vadd.f32 %v2899_v6, %v2814_v14  ;;  %v6569_v14 = vld [vmem:[%s7825_s3 + $0x68] sm:$0xff] }
 0x3d7   : > { %v2901_v11 = vpop.f32.mrf.mxu0  ;;  %v3130_v12 = vpop.f32.mrf.mxu1 }
 0x3d8   : > { %v3136_v20 = vadd.f32 %v3130_v12, %v2976_v15  ;;  %v2975_v23 = vadd.f32 %v2901_v11, %v2815_v18 }
 0x3d9   : > { %v3059_v16 = vpop.f32.mrf.mxu0  ;;  %v6778_v17 = vpop.f32.mrf.mxu1 }
 0x3da   : > { %v3134_v24 = vadd.f32 %v3059_v16, %v2974_v19  ;;  %v6572_v19 = vld [vmem:[%s7825_s3 + $0x70] sm:$0xff] }
 0x3db   : > { %v3061_v21 = vpop.f32.mrf.mxu0  ;;  %v3290_v22 = vpop.f32.mrf.mxu1 }
 0x3dc   : > { %v3296_v25 = vadd.f32 %v3290_v22, %v3136_v20  ;;  %v3135_v29 = vadd.f32 %v3061_v21, %v2975_v23 }
 0x3dd   : > { %v3219_v26 = vpop.f32.mrf.mxu0  ;;  %v6783_v28 = vpop.f32.mrf.mxu1 }
 0x3de   : > { %v3294_v30 = vadd.f32 %v3219_v26, %v3134_v24  ;;  %v3304_v34 = vadd.f32 %v3300_v32, %v3296_v25  ;;  %v6575_v24 = vld [vmem:[%s7825_s3 + $0x78] sm:$0xff] }
 0x3df   : > { %v3221_v33 = vpop.f32.mrf.mxu0 }
 0x3e0   : > { %v3302_v36 = vadd.f32 %v3300_v32, %v3294_v30  ;;  %v3295_v37 = vadd.f32 %v3221_v33, %v3135_v29  ;;  %v3307_v40 = vmax.f32 %v3304_v34, 0.0  ;;  %v6578_v30 = vld [vmem:[%s7825_s3 + $0x80] sm:$0xff] }
 0x3e2   : > { %v3305_v38 = vmax.f32 %v3302_v36, 0.0  ;;  %v3303_v39 = vadd.f32 %v3300_v32, %v3295_v37  ;;  %v3310_v44 = vsel %vm7332_vm5, %v3307_v40, 0.0  ;;  %v6581_v37 = vld [vmem:[%s7825_s3 + $0x88] sm:$0xff] }
 0x3e4   : > { %v3306_v41 = vmax.f32 %v3303_v39, 0.0  ;;  %v3308_v42 = vsel %vm7321_vm1, %v3305_v38, 0.0 }
 0x3e5   : > { %3314 = vrot.lane.b32.xlu0 %v3308_v42, %s7005_s18 }
 0x3e6   : > { %v3309_v43 = vsel %vm7325_vm2, %v3306_v41, 0.0 }
 0x3e7   : > { %3316 = vrot.lane.b32.xlu1 %v3309_v43, %s7005_s18 }
 0x3e9   : > { %3318 = vrot.lane.b32.xlu0 %v3310_v44, %s7005_s18 }
 0x457   : > { %v3315_v45 = vpop.permute.xlu0 %3314 }
 0x458   : > { %3325 = vst.msk [vmem:[#allocation2] sm:$0xff] %vm1862_vm6, %v3315_v45 }
 0x459   : > { %v3317_v46 = vpop.permute.xlu1 %3316 }
 0x45a   : > { %v3320_v51 = vsel %vm277_vm0, %v3315_v45, %v3317_v46 }
 0x45b   : > { %v3319_v47 = vpop.permute.xlu0 %3318 }
 0x45c   : > { %v3321_v48 = vsel %vm277_vm0, %v3317_v46, %v3319_v47 }
 0x45d   : > { %3327 = vst.msk [vmem:[#allocation2 + $0x10] sm:$0xff] %vm1865_vm13, %v3321_v48 }
 0x45f   : > { %v3332_v49 = vld [vmem:[#allocation2] sm:$0xff] }
 0x460   : > { %3641 = vrot.lane.b32.xlu0 %v3332_v49, %s7008_s20  ;;  %3340 = vrot.lane.b32.xlu1 %v3332_v49, %s7007_s19 }
 0x464   : > { %3961 = vrot.lane.b32.xlu0 %v3332_v49, %s7010_s22  ;;  %3801 = vrot.lane.b32.xlu1 %v3332_v49, %s7009_s21  ;;  %v3334_v50 = vld [vmem:[#allocation2 + $0x10] sm:$0xff] }
 0x468   : > { %4121 = vrot.lane.b32.xlu1 %v3332_v49, %s7011_s23  ;;  %3344 = vrot.lane.b32.xlu0 %v3334_v50, %s7007_s19 }
 0x46c   : > { %3342 = vrot.lane.b32.xlu1 %v3320_v51, %s7007_s19  ;;  %4281 = vrot.lane.b32.xlu0 %v3332_v49, %s7012_s29 }
 0x470   : > { %4441 = vrot.lane.b32.xlu1 %v3332_v49, %s7013_s8  ;;  %3643 = vrot.lane.b32.xlu0 %v3320_v51, %s7008_s20 }
 0x474   : > { %3645 = vrot.lane.b32.xlu1 %v3334_v50, %s7008_s20  ;;  %3805 = vrot.lane.b32.xlu0 %v3334_v50, %s7009_s21 }
 0x478   : > { %3803 = vrot.lane.b32.xlu1 %v3320_v51, %s7009_s21  ;;  %3963 = vrot.lane.b32.xlu0 %v3320_v51, %s7010_s22 }
 0x47c   : > { %3965 = vrot.lane.b32.xlu1 %v3334_v50, %s7010_s22  ;;  %4125 = vrot.lane.b32.xlu0 %v3334_v50, %s7011_s23 }
 0x480   : > { %4123 = vrot.lane.b32.xlu1 %v3320_v51, %s7011_s23  ;;  %4283 = vrot.lane.b32.xlu0 %v3320_v51, %s7012_s29 }
 0x484   : > { %4285 = vrot.lane.b32.xlu1 %v3334_v50, %s7012_s29  ;;  %4445 = vrot.lane.b32.xlu0 %v3334_v50, %s7013_s8 }
 0x488   : > { %4443 = vrot.lane.b32.xlu1 %v3320_v51, %s7013_s8  ;;  %4603 = vrot.lane.b32.xlu0 %v3320_v51, %s7015_s9 }
 0x48c   : > { %4605 = vrot.lane.b32.xlu1 %v3334_v50, %s7015_s9  ;;  %4601 = vrot.lane.b32.xlu0 %v3332_v49, %s7015_s9 }
 0x490   : > { %4761 = vperm.xlu1 %6939, %v6556_v52  }
 0x4d2   : > { %v3341_v53 = vpop.permute.xlu1 %3340  ;;  %v3642_v54 = vpop.permute.xlu0 %3641 }
 0x4d6   : > { %v3802_v55 = vpop.permute.xlu1 %3801  ;;  %v3962_v56 = vpop.permute.xlu0 %3961 }
 0x4da   : > { %v7522_v58 = vpop.permute.xlu1 %4121  ;;  %v3345_v59 = vpop.permute.xlu0 %3344 }
 0x4db   : > { %6785 = vmatpush3.msra.mxu1 %v3345_v59 }
 0x4dc   : > { %6789 = vmatprep.subr.mxu1 %v7004_v0  ;;  %6787 = vmatmul.mubr.msk.f32.vlgmr.msra.gmra.mxu1 %vm1888_vm14, %v6558_v57 }
 0x4dd   : > { %6790 = vmatpush3.msra.mxu1 %v3334_v50  ;;  %6791 = vmatprep.mubr.msk.f32.mxu1 %vm7006_vm4, %v7004_v0 }
 0x4de   : > { %v3343_v61 = vpop.permute.xlu1 %3342  ;;  %v7531_v62 = vpop.permute.xlu0 %4281  ;;  %6794 = vmatprep.subr.mxu1 %v7004_v0 }
 0x4df   : > { %v3346_v63 = vsel %vm320_vm7, %v3341_v53, %v3343_v61  ;;  %v3347_v1 = vsel %vm320_vm7, %v3343_v61, %v3345_v59 }
 0x4e0   : > { %3384 = vmatprep.subr.mxu0 %v3347_v1  ;;  %6792 = vmatmul.mubr.msk.f32.vlgmr.msra.gmra.mxu1 %vm1888_vm14, %v6557_v60 }
 0x4e1   : > { %3385 = vmatpush1.msra.mxu0 %v3346_v63  ;;  %6796 = vmatprep.mubr.msk.f32.mxu1 %vm7006_vm4, %v7004_v0 }
 0x4e2   : > { %v7539_v2 = vpop.permute.xlu1 %4441  ;;  %6559 = vmatmul.mubr.msk.f32.vlgmr.msra.gmra.mxu0 %vm1888_vm14, %v6558_v57  ;;  %3528 = vmatprep.subr.mxu0 %v3320_v51  ;;  %v3644_v3 = vpop.permute.xlu0 %3643 }
 0x4e3   : > { %3529 = vmatpush1.msra.mxu0 %v3332_v49  ;;  %3562 = vmatprep.mubr.f32.mxu0 %v7004_v0  ;;  %v3647_v8 = vsel %vm633_vm8, %v3642_v54, %v3644_v3 }
 0x4e6   : > { %v3646_v5 = vpop.permute.xlu1 %3645  ;;  %6561 = vmatmul.mubr.msk.f32.vlgmr.msra.gmra.mxu0 %vm1888_vm14, %v6557_v60  ;;  %v3806_v6 = vpop.permute.xlu0 %3805 }
 0x4e7   : > { %6795 = vmatpush3.msra.mxu1 %v3646_v5  ;;  %v3648_v7 = vsel %vm633_vm8, %v3644_v3, %v3646_v5  ;;  %3719 = vmatprep.mubr.f32.mxu0 %v7004_v0 }
 0x4e8   : > { %3685 = vmatprep.subr.mxu0 %v3648_v7  ;;  %6797 = vmatmul.mubr.msk.f32.vlgmr.msra.gmra.mxu1 %vm1888_vm14, %v6563_v4 }
 0x4e9   : > { %6799 = vmatprep.subr.mxu1 %v7004_v0  ;;  %3686 = vmatpush1.msra.mxu0 %v3647_v8 }
 0x4ea   : > { %6800 = vmatpush3.msra.mxu1 %v3806_v6  ;;  %v3804_v10 = vpop.permute.xlu1 %3803  ;;  %6564 = vmatmul.mubr.msk.f32.vlgmr.msra.gmra.mxu0 %vm1888_vm14, %v6563_v4  ;;  %v3964_v11 = vpop.permute.xlu0 %3963 }
 0x4eb   : > { %v3807_v12 = vsel %vm797_vm9, %v3802_v55, %v3804_v10  ;;  %6801 = vmatprep.mubr.msk.f32.mxu1 %vm7006_vm4, %v7004_v0  ;;  %v3808_v13 = vsel %vm797_vm9, %v3804_v10, %v3806_v6  ;;  %3879 = vmatprep.mubr.f32.mxu0 %v7004_v0  ;;  %v3967_v18 = vsel %vm961_vm10, %v3962_v56, %v3964_v11 }
 0x4ec   : > { %3845 = vmatprep.subr.mxu0 %v3808_v13  ;;  %6802 = vmatmul.mubr.msk.f32.vlgmr.msra.gmra.mxu1 %vm1888_vm14, %v6566_v9 }
 0x4ed   : > { %3846 = vmatpush1.msra.mxu0 %v3807_v12  ;;  %6804 = vmatprep.subr.mxu1 %v7004_v0 }
 0x4ee   : > { %v3966_v15 = vpop.permute.xlu1 %3965  ;;  %6567 = vmatmul.mubr.msk.f32.vlgmr.msra.gmra.mxu0 %vm1888_vm14, %v6566_v9  ;;  %v4126_v16 = vpop.permute.xlu0 %4125  ;;  %6806 = vmatprep.mubr.msk.f32.mxu1 %vm7006_vm4, %v7004_v0 }
 0x4ef   : > { %6805 = vmatpush3.msra.mxu1 %v3966_v15  ;;  %v3968_v17 = vsel %vm961_vm10, %v3964_v11, %v3966_v15  ;;  %4039 = vmatprep.mubr.f32.mxu0 %v7004_v0 }
 0x4f0   : > { %4005 = vmatprep.subr.mxu0 %v3968_v17  ;;  %6807 = vmatmul.mubr.msk.f32.vlgmr.msra.gmra.mxu1 %vm1888_vm14, %v6569_v14 }
 0x4f1   : > { %6809 = vmatprep.subr.mxu1 %v7004_v0  ;;  %4006 = vmatpush1.msra.mxu0 %v3967_v18 }
 0x4f2   : > { %6810 = vmatpush3.msra.mxu1 %v4126_v16  ;;  %v4124_v20 = vpop.permute.xlu1 %4123  ;;  %6570 = vmatmul.mubr.msk.f32.vlgmr.msra.gmra.mxu0 %vm1888_vm14, %v6569_v14  ;;  %v4284_v21 = vpop.permute.xlu0 %4283 }
 0x4f3   : > { %v4127_v22 = vsel %vm1125_vm11, %v7522_v58, %v4124_v20  ;;  %6811 = vmatprep.mubr.msk.f32.mxu1 %vm7006_vm4, %v7004_v0  ;;  %v4128_v23 = vsel %vm1125_vm11, %v4124_v20, %v4126_v16  ;;  %4199 = vmatprep.mubr.f32.mxu0 %v7004_v0  ;;  %v4287_v29 = vsel %vm1289_vm12, %v7531_v62, %v4284_v21 }
 0x4f4   : > { %4165 = vmatprep.subr.mxu0 %v4128_v23  ;;  %6812 = vmatmul.mubr.msk.f32.vlgmr.msra.gmra.mxu1 %vm1888_vm14, %v6572_v19 }
 0x4f5   : > { %4166 = vmatpush1.msra.mxu0 %v4127_v22  ;;  %6814 = vmatprep.subr.mxu1 %v7004_v0 }
 0x4f6   : > { %v4286_v25 = vpop.permute.xlu1 %4285  ;;  %6573 = vmatmul.mubr.msk.f32.vlgmr.msra.gmra.mxu0 %vm1888_vm14, %v6572_v19  ;;  %v4446_v26 = vpop.permute.xlu0 %4445  ;;  %6816 = vmatprep.mubr.msk.f32.mxu1 %vm7006_vm4, %v7004_v0 }
 0x4f7   : > { %6815 = vmatpush3.msra.mxu1 %v4286_v25  ;;  %v4288_v28 = vsel %vm1289_vm12, %v4284_v21, %v4286_v25  ;;  %4359 = vmatprep.mubr.f32.mxu0 %v7004_v0 }
 0x4f8   : > { %4325 = vmatprep.subr.mxu0 %v4288_v28  ;;  %6817 = vmatmul.mubr.msk.f32.vlgmr.msra.gmra.mxu1 %vm1888_vm14, %v6575_v24 }
 0x4f9   : > { %6819 = vmatprep.subr.mxu1 %v7004_v0  ;;  %4326 = vmatpush1.msra.mxu0 %v4287_v29 }
 0x4fa   : > { %6820 = vmatpush3.msra.mxu1 %v4446_v26  ;;  %v4444_v32 = vpop.permute.xlu1 %4443  ;;  %6576 = vmatmul.mubr.msk.f32.vlgmr.msra.gmra.mxu0 %vm1888_vm14, %v6575_v24  ;;  %v4604_v33 = vpop.permute.xlu0 %4603 }
 0x4fb   : > { %v4447_v34 = vsel %vm7848_vm3, %v7539_v2, %v4444_v32  ;;  %6821 = vmatprep.mubr.msk.f32.mxu1 %vm7006_vm4, %v7004_v0  ;;  %v4448_v36 = vsel %vm7849_vm15, %v4444_v32, %v4446_v26  ;;  %4519 = vmatprep.mubr.f32.mxu0 %v7004_v0  ;;  %vm7850_vm3 = vcmask 736256  }
 0x4fc   : > { %4485 = vmatprep.subr.mxu0 %v4448_v36  ;;  %6822 = vmatmul.mubr.msk.f32.vlgmr.msra.gmra.mxu1 %vm1888_vm14, %v6578_v30  ;;  %vm7851_vm15 = vmmov %vm7850_vm3 }
 0x4fd   : > { %4486 = vmatpush1.msra.mxu0 %v4447_v34  ;;  %6824 = vmatprep.subr.mxu1 %v7004_v0 }
 0x4fe   : > { %v4606_v38 = vpop.permute.xlu1 %4605  ;;  %6579 = vmatmul.mubr.msk.f32.vlgmr.msra.gmra.mxu0 %vm1888_vm14, %v6578_v30  ;;  %v4602_v39 = vpop.permute.xlu0 %4601  ;;  %6826 = vmatprep.mubr.msk.f32.mxu1 %vm7006_vm4, %v7004_v0 }
 0x4ff   : > { %v4607_v40 = vsel %vm7850_vm3, %v4602_v39, %v4604_v33  ;;  %6825 = vmatpush3.msra.mxu1 %v4606_v38  ;;  %v4608_v41 = vsel %vm7851_vm15, %v4604_v33, %v4606_v38  ;;  %4679 = vmatprep.mubr.f32.mxu0 %v7004_v0 }
 0x500   : > { %4645 = vmatprep.subr.mxu0 %v4608_v41  ;;  %6827 = vmatmul.mubr.msk.f32.vlgmr.msra.gmra.mxu1 %vm1888_vm14, %v6581_v37 }
 0x501   : > { %4646 = vmatpush1.msra.mxu0 %v4607_v40  ;;  %6829 = vmatprep.subr.mxu1 %v7004_v0 }
 0x502   : > { %6582 = vmatmul.mubr.msk.f32.vlgmr.msra.gmra.mxu0 %vm1888_vm14, %v6581_v37  ;;  %6831 = vmatprep.mubr.msk.f32.mxu1 %vm7006_vm4, %v7004_v0 }
 0x503   : > { %4880 = vmatprep.mubr.f32.mxu0 %v7004_v0 }
 0x50b   : > { %v4762_v40 = vpop.permute.xlu1 %4761 }
 0x59c   : > { %v3491_v42 = vpop.f32.mrf.mxu1 }
 0x59e   : > { %v6788_v43 = vpop.f32.mrf.mxu1 }
 0x5a0   : > { %v3635_v44 = vpop.f32.mrf.mxu1 }
 0x5a1   : > { %v3636_v55 = vadd.f32 %v3635_v44, %v3491_v42 }
 0x5a2   : > { %v3420_v45 = vpop.f32.mrf.mxu0  ;;  %v6793_v46 = vpop.f32.mrf.mxu1 }
 0x5a4   : > { %v3422_v47 = vpop.f32.mrf.mxu0 }
 0x5a6   : > { %v3564_v48 = vpop.f32.mrf.mxu0 }
 0x5a7   : > { %v3565_v2 = vadd.f32 %v3564_v48, %v3420_v45 }
 0x5a8   : > { %v3566_v49 = vpop.f32.mrf.mxu0  ;;  %v3792_v50 = vpop.f32.mrf.mxu1 }
 0x5a9   : > { %v3798_v60 = vadd.f32 %v3792_v50, %v3636_v55  ;;  %v3567_v6 = vadd.f32 %v3566_v49, %v3422_v47 }
 0x5aa   : > { %v3721_v51 = vpop.f32.mrf.mxu0  ;;  %v6798_v52 = vpop.f32.mrf.mxu1 }
 0x5ab   : > { %v3796_v7 = vadd.f32 %v3721_v51, %v3565_v2  ;;  %v6585_v2 = vld [vmem:[%s7825_s3 + $0x90] sm:$0xff] }
 0x5ac   : > { %v3723_v53 = vpop.f32.mrf.mxu0  ;;  %v3952_v54 = vpop.f32.mrf.mxu1 }
 0x5ad   : > { %v3958_v3 = vadd.f32 %v3952_v54, %v3798_v60  ;;  %v3797_v10 = vadd.f32 %v3723_v53, %v3567_v6 }
 0x5ae   : > { %v3881_v56 = vpop.f32.mrf.mxu0  ;;  %v6803_v57 = vpop.f32.mrf.mxu1 }
 0x5af   : > { %v3956_v11 = vadd.f32 %v3881_v56, %v3796_v7  ;;  %v6584_v56 = vld [vmem:[%s7826_s4 + $0x10] sm:$0xff]  ;;  %v6232_v57 = vld [vmem:[%s7828_s6] sm:$0xff] }
 0x5b0   : > { %v3883_v58 = vpop.f32.mrf.mxu0  ;;  %v4112_v59 = vpop.f32.mrf.mxu1 }
 0x5b1   : > { %v4118_v12 = vadd.f32 %v4112_v59, %v3958_v3  ;;  %v3957_v15 = vadd.f32 %v3883_v58, %v3797_v10 }
 0x5b2   : > { %v4041_v61 = vpop.f32.mrf.mxu0  ;;  %v6808_v62 = vpop.f32.mrf.mxu1 }
 0x5b3   : > { %v4116_v16 = vadd.f32 %v4041_v61, %v3956_v11  ;;  %v6586_v62 = vld [vmem:[%s7825_s3 + $0x98] sm:$0xff] }
 0x5b4   : > { %v4043_v63 = vpop.f32.mrf.mxu0  ;;  %v4272_v1 = vpop.f32.mrf.mxu1 }
 0x5b5   : > { %v4278_v17 = vadd.f32 %v4272_v1, %v4118_v12  ;;  %v4117_v20 = vadd.f32 %v4043_v63, %v3957_v15 }
 0x5b6   : > { %v4201_v4 = vpop.f32.mrf.mxu0  ;;  %v6813_v5 = vpop.f32.mrf.mxu1 }
 0x5b7   : > { %v4276_v21 = vadd.f32 %v4201_v4, %v4116_v16 }
 0x5b8   : > { %v4203_v8 = vpop.f32.mrf.mxu0  ;;  %v4432_v9 = vpop.f32.mrf.mxu1 }
 0x5b9   : > { %v4438_v22 = vadd.f32 %v4432_v9, %v4278_v17  ;;  %v4277_v25 = vadd.f32 %v4203_v8, %v4117_v20  ;;  %v6591_v9 = vld [vmem:[%s7825_s3 + $0xa0] sm:$0xff] }
 0x5ba   : > { %v4361_v13 = vpop.f32.mrf.mxu0  ;;  %v6818_v14 = vpop.f32.mrf.mxu1 }
 0x5bb   : > { %v4436_v26 = vadd.f32 %v4361_v13, %v4276_v21  ;;  %v6594_v14 = vld [vmem:[%s7825_s3 + $0xa8] sm:$0xff] }
 0x5bc   : > { %v4363_v18 = vpop.f32.mrf.mxu0  ;;  %v4592_v19 = vpop.f32.mrf.mxu1 }
 0x5bd   : > { %v4598_v28 = vadd.f32 %v4592_v19, %v4438_v22  ;;  %v4437_v32 = vadd.f32 %v4363_v18, %v4277_v25  ;;  %v6597_v19 = vld [vmem:[%s7825_s3 + $0xb0] sm:$0xff] }
 0x5be   : > { %v4521_v23 = vpop.f32.mrf.mxu0  ;;  %v6823_v24 = vpop.f32.mrf.mxu1 }
 0x5bf   : > { %v4596_v33 = vadd.f32 %v4521_v23, %v4436_v26  ;;  %v6600_v24 = vld [vmem:[%s7825_s3 + $0xb8] sm:$0xff] }
 0x5c0   : > { %v4523_v29 = vpop.f32.mrf.mxu0  ;;  %v4752_v30 = vpop.f32.mrf.mxu1 }
 0x5c1   : > { %v4758_v34 = vadd.f32 %v4752_v30, %v4598_v28  ;;  %v4597_v38 = vadd.f32 %v4523_v29, %v4437_v32  ;;  %v6603_v30 = vld [vmem:[%s7825_s3 + $0xc0] sm:$0xff] }
 0x5c2   : > { %v4681_v36 = vpop.f32.mrf.mxu0  ;;  %v6828_v37 = vpop.f32.mrf.mxu1 }
 0x5c3   : > { %v4756_v39 = vadd.f32 %v4681_v36, %v4596_v33  ;;  %v4766_v42 = vadd.f32 %v4762_v40, %v4758_v34  ;;  %v6606_v37 = vld [vmem:[%s7825_s3 + $0xc8] sm:$0xff] }
 0x5c4   : > { %v4683_v41 = vpop.f32.mrf.mxu0 }
 0x5c5   : > { %v4764_v43 = vadd.f32 %v4762_v40, %v4756_v39  ;;  %v4757_v44 = vadd.f32 %v4683_v41, %v4597_v38  ;;  %v4769_v47 = vmax.f32 %v4766_v42, 0.0  ;;  %v6230_v42 = vld [vmem:[%s7115_s17] sm:$0xff] }
 0x5c7   : > { %v4767_v45 = vmax.f32 %v4764_v43, 0.0  ;;  %v4765_v46 = vadd.f32 %v4762_v40, %v4757_v44  ;;  %v4772_v51 = vsel %vm7332_vm5, %v4769_v47, 0.0  ;;  %v6609_v43 = vld [vmem:[%s7825_s3 + $0xd0] sm:$0xff] }
 0x5c9   : > { %v4768_v48 = vmax.f32 %v4765_v46, 0.0  ;;  %v4770_v49 = vsel %vm7321_vm1, %v4767_v45, 0.0 }
 0x5ca   : > { %4776 = vrot.lane.b32.xlu0 %v4770_v49, %s7005_s18  ;;  %v6240_v49 = vcombine.high %v6230_v42, %v6230_v42 }
 0x5cb   : > { %v4771_v50 = vsel %vm7325_vm2, %v4768_v48, 0.0  ;;  %v6231_v48 = vld [vmem:[%s7115_s17 + $0x8] sm:$0xf]  ;;  %s269_s17 = sand.u32 1, %s6994_s25  }
 0x5cc   : > { %4778 = vrot.lane.b32.xlu1 %v4771_v50, %s7005_s18  ;;  %v6229_v50 = vld [vmem:[%s7827_s5] sm:$0xff]  ;;  %s6879_s15 = smul.u32 24, %s269_s17 }
 0x5ce   : > { %4780 = vrot.lane.b32.xlu0 %v4772_v51, %s7005_s18  ;;  %s271_s18 = scalar_lea.vmem [#allocation3], %s6879_s15 }
 0x63c   : > { %v4777_v52 = vpop.permute.xlu0 %4776 }
 0x63d   : > { %4787 = vst.msk [vmem:[#allocation2] sm:$0xff] %vm1862_vm6, %v4777_v52 }
 0x63e   : > { %v4779_v53 = vpop.permute.xlu1 %4778 }
 0x63f   : > { %v4782_v54 = vsel %vm277_vm0, %v4777_v52, %v4779_v53 }
 0x640   : > { %4788 = vst [vmem:[#allocation2 + $0x8] sm:$0xff] %v4782_v54  ;;  %v4781_v27 = vpop.permute.xlu0 %4780 }
 0x641   : > { %v4783_v55 = vsel %vm277_vm0, %v4779_v53, %v4781_v27  ;;  %vm7852_vm0 = vcmask 744448  }
 0x642   : > { %4789 = vst.msk [vmem:[#allocation2 + $0x10] sm:$0xff] %vm1865_vm13, %v4783_v55 }
 0x644   : > { %v4794_v31 = vld [vmem:[#allocation2] sm:$0xff] }
 0x645   : > { %5103 = vrot.lane.b32.xlu0 %v4794_v31, %s7008_s20  ;;  %4802 = vrot.lane.b32.xlu1 %v4794_v31, %s7007_s19 }
 0x649   : > { %5423 = vrot.lane.b32.xlu0 %v4794_v31, %s7010_s22  ;;  %5263 = vrot.lane.b32.xlu1 %v4794_v31, %s7009_s21  ;;  %v4796_v35 = vld [vmem:[#allocation2 + $0x10] sm:$0xff] }
 0x64d   : > { %5583 = vrot.lane.b32.xlu1 %v4794_v31, %s7011_s23  ;;  %4806 = vrot.lane.b32.xlu0 %v4796_v35, %s7007_s19 }
 0x651   : > { %5743 = vrot.lane.b32.xlu0 %v4794_v31, %s7012_s29  ;;  %4804 = vrot.lane.b32.xlu1 %v4782_v54, %s7007_s19  ;;  %s6413_s19 = sshll.u32 %s271_s18, 4  ;;  %s6414_s19 = int_to_ptr.vmem [resolvable:$true] %s6413_s19 }
 0x655   : > { %5105 = vrot.lane.b32.xlu0 %v4782_v54, %s7008_s20  ;;  %5903 = vrot.lane.b32.xlu1 %v4794_v31, %s7013_s8 }
 0x659   : > { %5267 = vrot.lane.b32.xlu0 %v4796_v35, %s7009_s21  ;;  %5107 = vrot.lane.b32.xlu1 %v4796_v35, %s7008_s20 }
 0x65d   : > { %5425 = vrot.lane.b32.xlu0 %v4782_v54, %s7010_s22  ;;  %5265 = vrot.lane.b32.xlu1 %v4782_v54, %s7009_s21 }
 0x661   : > { %5587 = vrot.lane.b32.xlu0 %v4796_v35, %s7011_s23  ;;  %5427 = vrot.lane.b32.xlu1 %v4796_v35, %s7010_s22  ;;  %s6411_s22 = scalar_lea.hbm %s7829_s7, %s6887_s16 }
 0x665   : > { %5745 = vrot.lane.b32.xlu0 %v4782_v54, %s7012_s29  ;;  %5585 = vrot.lane.b32.xlu1 %v4782_v54, %s7011_s23  ;;  %s6399_s23 = scalar_lea.sflag [#allocation4], %s269_s17 }
 0x669   : > { %5907 = vrot.lane.b32.xlu0 %v4796_v35, %s7013_s8  ;;  %5747 = vrot.lane.b32.xlu1 %v4796_v35, %s7012_s29  ;;  %s6942_s29 = scalar_lea.vmem %s6414_s19, 384 }
 0x66a   : > { %p6943_p11 = scmp.ne.s32.totalorder %s6414_s19, %s6942_s29 }
 0x66c   : > { %p6944_p12 = pnand %p6943_p11, %p7095_p5 }
 0x66d   : > { %6065 = vrot.lane.b32.xlu0 %v4782_v54, %s7015_s9  ;;  %5905 = vrot.lane.b32.xlu1 %v4782_v54, %s7013_s8  ;;  %s6946_s8 = sshll.u32 %s7016_s28, 4  ;;  %s6947_s8 = int_to_ptr.vmem [resolvable:$false] %s6946_s8 }
 0x66e   : > { %p6945_p13 = pneg %p6944_p12  ;;  %p6949_p0 = scmp.lt.s32.totalorder %s6414_s19, %s6947_s8 }
 0x671   : > { %6063 = vrot.lane.b32.xlu0 %v4794_v31, %s7015_s9  ;;  %6067 = vrot.lane.b32.xlu1 %v4796_v35, %s7015_s9  ;;  %s6948_s9 = scalar_lea.vmem %s6947_s8, 768 }
 0x672   : > { %p6950_p1 = scmp.lt.s32.totalorder %s6948_s9, %s6942_s29 }
 0x674   : > { %p6951_p2 = por %p6950_p1, %p6949_p0 }
 0x675   : > { %6223 = vperm.xlu1 %6939, %v6584_v56   ;;  %6235 = vperm.xlu0 %6940, %v6232_v57  }
 0x676   : > { %p6952_p3 = pnand %p6951_p2, %p6945_p13 }
 0x6b7   : > { %v5104_v58 = vpop.permute.xlu0 %5103  ;;  %v4803_v59 = vpop.permute.xlu1 %4802 }
 0x6bb   : > { %v5424_v60 = vpop.permute.xlu0 %5423  ;;  %v5264_v61 = vpop.permute.xlu1 %5263 }
 0x6bf   : > { %v4807_v63 = vpop.permute.xlu0 %4806  ;;  %v7671_v1 = vpop.permute.xlu1 %5583 }
 0x6c0   : > { %6830 = vmatpush3.msra.mxu1 %v4807_v63 }
 0x6c1   : > { %6834 = vmatprep.subr.mxu1 %v7004_v0  ;;  %6832 = vmatmul.mubr.msk.f32.vlgmr.msra.gmra.mxu1 %vm1888_vm14, %v6586_v62 }
 0x6c2   : > { %6835 = vmatpush3.msra.mxu1 %v4796_v35  ;;  %6836 = vmatprep.mubr.msk.f32.mxu1 %vm7006_vm4, %v7004_v0 }
 0x6c3   : > { %v7680_v3 = vpop.permute.xlu0 %5743  ;;  %v4805_v4 = vpop.permute.xlu1 %4804  ;;  %6839 = vmatprep.subr.mxu1 %v7004_v0 }
 0x6c4   : > { %v4808_v5 = vsel %vm320_vm7, %v4803_v59, %v4805_v4  ;;  %v4809_v6 = vsel %vm320_vm7, %v4805_v4, %v4807_v63  ;;  %vm7853_vm7 = vmmov %vm7852_vm0 }
 0x6c5   : > { %4846 = vmatprep.subr.mxu0 %v4809_v6  ;;  %6837 = vmatmul.mubr.msk.f32.vlgmr.msra.gmra.mxu1 %vm1888_vm14, %v6585_v2 }
 0x6c6   : > { %4847 = vmatpush1.msra.mxu0 %v4808_v5  ;;  %6841 = vmatprep.mubr.msk.f32.mxu1 %vm7006_vm4, %v7004_v0 }
 0x6c7   : > { %v5106_v7 = vpop.permute.xlu0 %5105  ;;  %6587 = vmatmul.mubr.msk.f32.vlgmr.msra.gmra.mxu0 %vm1888_vm14, %v6586_v62  ;;  %4990 = vmatprep.subr.mxu0 %v4782_v54  ;;  %v7689_v8 = vpop.permute.xlu1 %5903 }
 0x6c8   : > { %4991 = vmatpush1.msra.mxu0 %v4794_v31  ;;  %5024 = vmatprep.mubr.f32.mxu0 %v7004_v0  ;;  %v5109_v13 = vsel %vm633_vm8, %v5104_v58, %v5106_v7 }
 0x6cb   : > { %v5268_v10 = vpop.permute.xlu0 %5267  ;;  %6589 = vmatmul.mubr.msk.f32.vlgmr.msra.gmra.mxu0 %vm1888_vm14, %v6585_v2  ;;  %v5108_v11 = vpop.permute.xlu1 %5107 }
 0x6cc   : > { %6840 = vmatpush3.msra.mxu1 %v5108_v11  ;;  %v5110_v12 = vsel %vm633_vm8, %v5106_v7, %v5108_v11  ;;  %5181 = vmatprep.mubr.f32.mxu0 %v7004_v0  ;;  %vm7854_vm8 = vmmov %vm7850_vm3 }
 0x6cd   : > { %5147 = vmatprep.subr.mxu0 %v5110_v12  ;;  %6842 = vmatmul.mubr.msk.f32.vlgmr.msra.gmra.mxu1 %vm1888_vm14, %v6591_v9 }
 0x6ce   : > { %6844 = vmatprep.subr.mxu1 %v7004_v0  ;;  %5148 = vmatpush1.msra.mxu0 %v5109_v13 }
 0x6cf   : > { %6845 = vmatpush3.msra.mxu1 %v5268_v10  ;;  %v5426_v15 = vpop.permute.xlu0 %5425  ;;  %6592 = vmatmul.mubr.msk.f32.vlgmr.msra.gmra.mxu0 %vm1888_vm14, %v6591_v9  ;;  %v5266_v16 = vpop.permute.xlu1 %5265 }
 0x6d0   : > { %v5269_v17 = vsel %vm797_vm9, %v5264_v61, %v5266_v16  ;;  %6846 = vmatprep.mubr.msk.f32.mxu1 %vm7006_vm4, %v7004_v0  ;;  %v5270_v18 = vsel %vm797_vm9, %v5266_v16, %v5268_v10  ;;  %5341 = vmatprep.mubr.f32.mxu0 %v7004_v0  ;;  %v5429_v23 = vsel %vm961_vm10, %v5424_v60, %v5426_v15  ;;  %vm7855_vm9 = vmmov %vm7850_vm3 }
 0x6d1   : > { %5307 = vmatprep.subr.mxu0 %v5270_v18  ;;  %6847 = vmatmul.mubr.msk.f32.vlgmr.msra.gmra.mxu1 %vm1888_vm14, %v6594_v14 }
 0x6d2   : > { %5308 = vmatpush1.msra.mxu0 %v5269_v17  ;;  %6849 = vmatprep.subr.mxu1 %v7004_v0 }
 0x6d3   : > { %v5588_v20 = vpop.permute.xlu0 %5587  ;;  %6595 = vmatmul.mubr.msk.f32.vlgmr.msra.gmra.mxu0 %vm1888_vm14, %v6594_v14  ;;  %v5428_v21 = vpop.permute.xlu1 %5427  ;;  %6851 = vmatprep.mubr.msk.f32.mxu1 %vm7006_vm4, %v7004_v0 }
 0x6d4   : > { %6850 = vmatpush3.msra.mxu1 %v5428_v21  ;;  %v5430_v22 = vsel %vm961_vm10, %v5426_v15, %v5428_v21  ;;  %5501 = vmatprep.mubr.f32.mxu0 %v7004_v0  ;;  %vm7856_vm10 = vcmask 1043456  }
 0x6d5   : > { %5467 = vmatprep.subr.mxu0 %v5430_v22  ;;  %6852 = vmatmul.mubr.msk.f32.vlgmr.msra.gmra.mxu1 %vm1888_vm14, %v6597_v19  ;;  %vm7859_vm1 = vmmov %vm7856_vm10 }
 0x6d6   : > { %6854 = vmatprep.subr.mxu1 %v7004_v0  ;;  %5468 = vmatpush1.msra.mxu0 %v5429_v23 }
 0x6d7   : > { %6855 = vmatpush3.msra.mxu1 %v5588_v20  ;;  %v5746_v25 = vpop.permute.xlu0 %5745  ;;  %6598 = vmatmul.mubr.msk.f32.vlgmr.msra.gmra.mxu0 %vm1888_vm14, %v6597_v19  ;;  %v5586_v26 = vpop.permute.xlu1 %5585 }
 0x6d8   : > { %v5589_v28 = vsel %vm1125_vm11, %v7671_v1, %v5586_v26  ;;  %6856 = vmatprep.mubr.msk.f32.mxu1 %vm7006_vm4, %v7004_v0  ;;  %v5590_v29 = vsel %vm1125_vm11, %v5586_v26, %v5588_v20  ;;  %5661 = vmatprep.mubr.f32.mxu0 %v7004_v0  ;;  %v5749_v36 = vsel %vm1289_vm12, %v7680_v3, %v5746_v25  ;;  %vm7857_vm11 = vmmov %vm7856_vm10 }
 0x6d9   : > { %5627 = vmatprep.subr.mxu0 %v5590_v29  ;;  %6857 = vmatmul.mubr.msk.f32.vlgmr.msra.gmra.mxu1 %vm1888_vm14, %v6600_v24 }
 0x6da   : > { %5628 = vmatpush1.msra.mxu0 %v5589_v28  ;;  %6859 = vmatprep.subr.mxu1 %v7004_v0 }
 0x6db   : > { %v5908_v32 = vpop.permute.xlu0 %5907  ;;  %6601 = vmatmul.mubr.msk.f32.vlgmr.msra.gmra.mxu0 %vm1888_vm14, %v6600_v24  ;;  %v5748_v33 = vpop.permute.xlu1 %5747  ;;  %6861 = vmatprep.mubr.msk.f32.mxu1 %vm7006_vm4, %v7004_v0 }
 0x6dc   : > { %6860 = vmatpush3.msra.mxu1 %v5748_v33  ;;  %v5750_v34 = vsel %vm1289_vm12, %v5746_v25, %v5748_v33  ;;  %5821 = vmatprep.mubr.f32.mxu0 %v7004_v0  ;;  %vm7858_vm12 = vcmask 31744  }
 0x6dd   : > { %5787 = vmatprep.subr.mxu0 %v5750_v34  ;;  %6862 = vmatmul.mubr.msk.f32.vlgmr.msra.gmra.mxu1 %vm1888_vm14, %v6603_v30  ;;  %vm7860_vm2 = vmmov %vm7858_vm12 }
 0x6de   : > { %6864 = vmatprep.subr.mxu1 %v7004_v0  ;;  %5788 = vmatpush1.msra.mxu0 %v5749_v36 }
 0x6df   : > { %6865 = vmatpush3.msra.mxu1 %v5908_v32  ;;  %v6066_v38 = vpop.permute.xlu0 %6065  ;;  %6604 = vmatmul.mubr.msk.f32.vlgmr.msra.gmra.mxu0 %vm1888_vm14, %v6603_v30  ;;  %v5906_v39 = vpop.permute.xlu1 %5905 }
 0x6e0   : > { %v5909_v40 = vsel %vm7852_vm0, %v7689_v8, %v5906_v39  ;;  %6866 = vmatprep.mubr.msk.f32.mxu1 %vm7006_vm4, %v7004_v0  ;;  %v5910_v41 = vsel %vm7853_vm7, %v5906_v39, %v5908_v32  ;;  %5981 = vmatprep.mubr.f32.mxu0 %v7004_v0 }
 0x6e1   : > { %5947 = vmatprep.subr.mxu0 %v5910_v41  ;;  %6867 = vmatmul.mubr.msk.f32.vlgmr.msra.gmra.mxu1 %vm1888_vm14, %v6606_v37 }
 0x6e2   : > { %5948 = vmatpush1.msra.mxu0 %v5909_v40  ;;  %6869 = vmatprep.subr.mxu1 %v7004_v0 }
 0x6e3   : > { %v6064_v44 = vpop.permute.xlu0 %6063  ;;  %6607 = vmatmul.mubr.msk.f32.vlgmr.msra.gmra.mxu0 %vm1888_vm14, %v6606_v37  ;;  %v6068_v45 = vpop.permute.xlu1 %6067  ;;  %6871 = vmatprep.mubr.msk.f32.mxu1 %vm7006_vm4, %v7004_v0 }
 0x6e4   : > { %v6069_v46 = vsel %vm7854_vm8, %v6064_v44, %v6066_v38  ;;  %6870 = vmatpush3.msra.mxu1 %v6068_v45  ;;  %v6070_v47 = vsel %vm7855_vm9, %v6066_v38, %v6068_v45  ;;  %6141 = vmatprep.mubr.f32.mxu0 %v7004_v0 }
 0x6e5   : > { %6107 = vmatprep.subr.mxu0 %v6070_v47  ;;  %6872 = vmatmul.mubr.msk.f32.vlgmr.msra.gmra.mxu1 %vm1888_vm14, %v6609_v43 }
 0x6e6   : > { %6108 = vmatpush1.msra.mxu0 %v6069_v46  ;;  %6874 = vmatprep.subr.mxu1 %v7004_v0 }
 0x6e7   : > { %6610 = vmatmul.mubr.msk.f32.vlgmr.msra.gmra.mxu0 %vm1888_vm14, %v6609_v43  ;;  %6875 = vmatpush3.msk.msra.mxu1 %vm7856_vm10, %v6231_v48 }
 0x6e8   : > { %6876 = vmatprep.mubr.msk.f32.mxu1 %vm7006_vm4, %v7004_v0  ;;  %6612 = vmatprep.subr.msk.mxu0 %vm7857_vm11, %v6240_v49  ;;  %vm6396_vm4 = vcmask 261120  }
 0x6e9   : > { %6877 = vmatmul.mubr.msk.f32.vlgmr.msra.gmra.mxu1 %vm7858_vm12, %v6229_v50  ;;  %6613 = vmatpush1.msk.msra.mxu0 %vm7859_vm1, %v6230_v42 }
 0x6ea   : > { %6314 = vmatprep.mubr.f32.mxu0 %v7004_v0 }
 0x6eb   : > { %6614 = vmatmul.mubr.msk.f32.vlgmr.msra.gmra.mxu0 %vm7860_vm2, %v6229_v50 }
 0x6f0   : > { %v6236_v41 = vpop.permute.xlu0 %6235  ;;  %v6224_v44 = vpop.permute.xlu1 %6223 }
 0x781   : > { %v4953_v51 = vpop.f32.mrf.mxu1 }
 0x783   : > { %v6833_v52 = vpop.f32.mrf.mxu1 }
 0x785   : > { %v5097_v53 = vpop.f32.mrf.mxu1 }
 0x786   : > { %v5098_v3 = vadd.f32 %v5097_v53, %v4953_v51 }
 0x787   : > { %v4882_v54 = vpop.f32.mrf.mxu0  ;;  %v6838_v27 = vpop.f32.mrf.mxu1 }
 0x789   : > { %v4884_v55 = vpop.f32.mrf.mxu0 }
 0x78b   : > { %v5026_v31 = vpop.f32.mrf.mxu0 }
 0x78c   : > { %v5027_v6 = vadd.f32 %v5026_v31, %v4882_v54 }
 0x78d   : > { %v5028_v35 = vpop.f32.mrf.mxu0  ;;  %v5254_v56 = vpop.f32.mrf.mxu1 }
 0x78e   : > { %v5260_v7 = vadd.f32 %v5254_v56, %v5098_v3  ;;  %v5029_v10 = vadd.f32 %v5028_v35, %v4884_v55 }
 0x78f   : > { %v5183_v57 = vpop.f32.mrf.mxu0  ;;  %v6843_v58 = vpop.f32.mrf.mxu1 }
 0x790   : > { %v5258_v11 = vadd.f32 %v5183_v57, %v5027_v6 }
 0x791   : > { %v5185_v59 = vpop.f32.mrf.mxu0  ;;  %v5414_v60 = vpop.f32.mrf.mxu1 }
 0x792   : > { %v5420_v12 = vadd.f32 %v5414_v60, %v5260_v7  ;;  %v5259_v15 = vadd.f32 %v5185_v59, %v5029_v10 }
 0x793   : > { %v5343_v61 = vpop.f32.mrf.mxu0  ;;  %v6848_v62 = vpop.f32.mrf.mxu1 }
 0x794   : > { %v5418_v16 = vadd.f32 %v5343_v61, %v5258_v11 }
 0x795   : > { %v5345_v63 = vpop.f32.mrf.mxu0  ;;  %v5574_v1 = vpop.f32.mrf.mxu1 }
 0x796   : > { %v5580_v17 = vadd.f32 %v5574_v1, %v5420_v12  ;;  %v5419_v20 = vadd.f32 %v5345_v63, %v5259_v15 }
 0x797   : > { %v5503_v0 = vpop.f32.mrf.mxu0  ;;  %v6853_v2 = vpop.f32.mrf.mxu1 }
 0x798   : > { %v5578_v21 = vadd.f32 %v5503_v0, %v5418_v16 }
 0x799   : > { %v5505_v4 = vpop.f32.mrf.mxu0  ;;  %v5734_v5 = vpop.f32.mrf.mxu1 }
 0x79a   : > { %v5740_v22 = vadd.f32 %v5734_v5, %v5580_v17  ;;  %v5579_v25 = vadd.f32 %v5505_v4, %v5419_v20 }
 0x79b   : > { %v5663_v8 = vpop.f32.mrf.mxu0  ;;  %v6858_v9 = vpop.f32.mrf.mxu1 }
 0x79c   : > { %v5738_v26 = vadd.f32 %v5663_v8, %v5578_v21 }
 0x79d   : > { %v5665_v13 = vpop.f32.mrf.mxu0  ;;  %v5894_v14 = vpop.f32.mrf.mxu1 }
 0x79e   : > { %v5900_v28 = vadd.f32 %v5894_v14, %v5740_v22  ;;  %v5739_v32 = vadd.f32 %v5665_v13, %v5579_v25 }
 0x79f   : > { %v5823_v18 = vpop.f32.mrf.mxu0  ;;  %v6863_v19 = vpop.f32.mrf.mxu1 }
 0x7a0   : > { %v5898_v33 = vadd.f32 %v5823_v18, %v5738_v26 }
 0x7a1   : > { %v5825_v23 = vpop.f32.mrf.mxu0  ;;  %v6054_v24 = vpop.f32.mrf.mxu1 }
 0x7a2   : > { %v6060_v34 = vadd.f32 %v6054_v24, %v5900_v28  ;;  %v5899_v38 = vadd.f32 %v5825_v23, %v5739_v32 }
 0x7a3   : > { %v5983_v29 = vpop.f32.mrf.mxu0  ;;  %v6868_v30 = vpop.f32.mrf.mxu1 }
 0x7a4   : > { %v6058_v39 = vadd.f32 %v5983_v29, %v5898_v33 }
 0x7a5   : > { %v5985_v36 = vpop.f32.mrf.mxu0  ;;  %v6214_v37 = vpop.f32.mrf.mxu1 }
 0x7a6   : > { %v6220_v40 = vadd.f32 %v6214_v37, %v6060_v34  ;;  %v6059_v45 = vadd.f32 %v5985_v36, %v5899_v38 }
 0x7a7   : > { %v6143_v42 = vpop.f32.mrf.mxu0  ;;  %v6873_v43 = vpop.f32.mrf.mxu1 }
 0x7a8   : > { %v6218_v46 = vadd.f32 %v6143_v42, %v6058_v39  ;;  %v6228_v49 = vadd.f32 %v6224_v44, %v6220_v40 }
 0x7a9   : > { %v6145_v47 = vpop.f32.mrf.mxu0  ;;  %v6387_v48 = vpop.f32.mrf.mxu1 }
 0x7aa   : > { %v6219_v50 = vadd.f32 %v6145_v47, %v6059_v45  ;;  %v6388_v51 = vadd.f32 %v6387_v48, %v6236_v41  ;;  %v6226_v54 = vadd.f32 %v6224_v44, %v6218_v46 }
 0x7ab   : > { %v6316_v52 = vpop.f32.mrf.mxu0  ;;  %v6878_v53 = vpop.f32.mrf.mxu1 }
 0x7ac   : > { %v6393_v27 = vadd.f32 %v6388_v51, %v6228_v49  ;;  %v6317_v55 = vadd.f32 %v6316_v52, %v6236_v41  ;;  %v6227_v35 = vadd.f32 %v6224_v44, %v6219_v50 }
 0x7ad   : > { %v6318_v31 = vpop.f32.mrf.mxu0 }
 0x7ae   : > { %6397 = vst.msk [vmem:[%s271_s18 + $0x10] sm:$0xff] %vm6396_vm4, %v6393_v27  ;;  %v6391_v56 = vadd.f32 %v6317_v55, %v6226_v54  ;;  %v6319_v57 = vadd.f32 %v6318_v31, %v6236_v41 }
 0x7b0   : > { %6394 = vst [vmem:[%s271_s18] sm:$0xff] %v6391_v56  ;;  %v6392_v58 = vadd.f32 %v6319_v57, %v6227_v35 }
 0x7b2   : > { %6395 = vst [vmem:[%s271_s18 + $0x8] sm:$0xff] %v6392_v58 }
 0x7b3   : > { %6955 = shalt.err (!%p6952_p3)
}
 0x7b4   : > { %s6956_s13 = scalar_lea.hbm %s6411_s22, 384  ;;  %s6960_s15 = scalar_lea.hbm %s7829_s7, 768 }
 0x7b5   : > { %p6957_p4 = scmp.ne.s32.totalorder %s6411_s22, %s6956_s13  ;;  %p6961_p9 = scmp.lt.s32.totalorder %s6411_s22, %s7829_s7 }
 0x7b6   : > { %p6962_p10 = scmp.lt.s32.totalorder %s6960_s15, %s6956_s13 }
 0x7b7   : > { %p6958_p7 = pnand %p6957_p4, %p7095_p5 }
 0x7b8   : > { %p6963_p11 = por %p6962_p10, %p6961_p9 }
 0x7b9   : > { %p6959_p8 = pneg %p6958_p7 }
 0x7bb   : > { %p6964_p12 = pnand %p6963_p11, %p6959_p8 }
 0x7bd   : > { %6967 = shalt.err (!%p6964_p12)
}
 0x7be   : > { %6888 = dma.vmem_to_hbm [thread:$0]  (%p7095_p5), %s6414_s19, 384, %s6411_s22, %s6399_s23  }
 0x7bf PF: > { %p6894_p13 = scmp.ge.s32.totalorder %s7002_s27, 2  ;;  %s6425_s20 = sand.u32 1, %s6990_s24  }
 0x7c0   : > { %s6426_s21 = scalar_lea.sflag [#allocation4], %s6425_s20 }
 0x7c1   : > { %p6891_p0 = pnand %p6894_p13, %p7099_p6 }
 0x7c3   : > { %p6892_p1 = pneg %p6891_p0 }
 0x7c5   : > { %6985 = dma.done.wait (%p6892_p1), %s6426_s21, 384  }
 0x7c6   : > { %6987 = vsyncadd (%p6892_p1), %s6426_s21, 4294966912  ;;  %p17_p2 = scmp.ge.s32.totalorder %s7082_s30, 4   ;;  %s7861_s24 = smov %s6994_s25 }
 0x7c7   : > { %s7862_s25 = smov %s6998_s26  ;;  %s7863_s26 = smov %s7093_s10 }
 0x7c8   : > { %s7864_s27 = smov %s7082_s30  ;;  %19 = sbr.rel (!%p17_p2) target bundleno = 3 (0x3), region = 119 }
 0x7cd   :  { %6431 = vsyncpa [#allocation4], 1 }
 0x7ce   :  { %6433 = vsyncpa [#allocation4 + $0x1], 1 }

</bundles_post_ra>
